<compile_context>
chip_gen: v5e
topology: v5e:2x2
jax: 0.10.0
libtpu: 0.0.40
codegen_flags: <defaults>
</compile_context>

<pallas_src>
import math
import functools

import jax
import jax.numpy as jnp
from jax.experimental import pallas as pl
from jax.experimental.pallas import tpu as pltpu

# ---------------- model hyper-parameters (small, synthetic) -----------------
B = 2          # batch
S = 8          # sequence length
D = 32         # d_model  (layer.size)
NUM_HEADS = 4  # heads in self-attention
D_FF = 64      # position-wise FFN hidden size
N_LAYERS = 2   # Encoder depth
EPS = 1e-6
PACK_COLS = 128   # lane width of the packed small-parameter / W_qkv slabs


# ------------------------------ kernel helpers -------------------------------
def _layernorm(x, a, b, eps):
    # matches torch: mean over last dim, std with Bessel correction (n-1),
    # then a*(x-mean)/sqrt(var+eps)+b   (exactly the given module's formula)
    d = x.shape[-1]
    mean = jnp.mean(x, axis=-1, keepdims=True)
    xc = x - mean
    var = jnp.sum(xc * xc, axis=-1, keepdims=True) * (1.0 / (d - 1))
    return a * xc * jax.lax.rsqrt(var + eps) + b


# ----------------------------- Pallas kernel ---------------------------------
def encoder_kernel(x_ref, mask_ref, wqkv_ref, wo_ref, w1_ref, w2_ref,
                   small_ref, out_ref, *, n_layers, num_heads, eps):
    x = x_ref[...]                           # [S, D]  (one sequence)
    m = mask_ref[0]                          # [1, S]  (1 = keep, 0 = pad)
    d = x.shape[-1]
    d_ff = w1_ref.shape[2]
    d_head = d // num_heads

    # Additive key-padding bias, built ONCE per grid step and reused by every
    # layer and head: 0 where the key is valid, else -1e9.
    bias = jnp.where(m != 0.0, 0.0, -1e9)    # [1, S] (broadcasts over queries)

    for l in range(n_layers):                # static unroll over layers
        sm = small_ref[l]                    # [8, PACK_COLS] slab of vectors
        a1, b1 = sm[0:1, :d], sm[1:2, :d]
        a2, b2 = sm[2:3, :d], sm[3:4, :d]
        bo, bf2 = sm[4:5, :d], sm[5:6, :d]
        bf1 = sm[6:7, :d_ff]
        bqkv = sm[7:8, :]                    # [1, 128] (zero-padded past 3D)

        # ---- sublayer 0:  x = x + SelfAttn(LayerNorm(x), mask) ----
        xn = _layernorm(x, a1, b1, eps)
        qkv = jnp.dot(xn, wqkv_ref[l],
                      preferred_element_type=jnp.float32) + bqkv   # [S, 128]
        # 1/sqrt(d_head) is already folded into the Q weight/bias columns.
        q = qkv[:, :d]
        k = qkv[:, d:2 * d]
        v = qkv[:, 2 * d:3 * d]

        heads = []
        for h in range(num_heads):           # static unroll over heads
            lo, hi = h * d_head, (h + 1) * d_head
            s = jax.lax.dot_general(q[:, lo:hi], k[:, lo:hi],
                                    (((1,), (1,)), ((), ())),
                                    preferred_element_type=jnp.float32)
            s = s + bias
            # shift-invariant numerical guard (exact softmax semantics)
            s = s - jnp.max(s, axis=-1, keepdims=True)
            p = jnp.exp(s)
            p = p * pl.reciprocal(jnp.sum(p, axis=-1, keepdims=True),
                                  approx=True)
            heads.append(jnp.dot(p, v[:, lo:hi],
                                 preferred_element_type=jnp.float32))
        # Merge heads with ONE output-projection matmul; add b_o once.
        attn = jnp.concatenate(heads, axis=-1)                     # [S, D]
        x = x + jnp.dot(attn, wo_ref[l],
                        preferred_element_type=jnp.float32) + bo

        # ---- sublayer 1:  x = x + FFN(LayerNorm(x)) ----
        xn2 = _layernorm(x, a2, b2, eps)
        h1 = jnp.maximum(
            jnp.dot(xn2, w1_ref[l], preferred_element_type=jnp.float32) + bf1,
            0.0)
        x = x + jnp.dot(h1, w2_ref[l],
                        preferred_element_type=jnp.float32) + bf2

    # ---- final LayerNorm ----
    fin = small_ref[n_layers]
    out_ref[...] = _layernorm(x, fin[0:1, :d], fin[1:2, :d],
                              eps).astype(out_ref.dtype)


# ------------------------------ wrappers --------------------------------------
def pack_params(layer_params, final_a, final_b):
    """Stack per-layer weights, fold the 1/sqrt(d_head) scale into Q, pad the
    fused QKV weight to a lane-dense [D, 128] slab, and pack all small vectors
    into one [L+1, 8, 128] slab."""
    assert 3 * D <= PACK_COLS and D_FF <= PACK_COLS
    scale = 1.0 / math.sqrt(D // NUM_HEADS)

    wqkv_list, slabs = [], []
    for p in layer_params:
        w = jnp.concatenate([p["wq"] * scale, p["wk"], p["wv"]], axis=1)
        w = jnp.pad(w, ((0, 0), (0, PACK_COLS - 3 * D)))          # [D, 128]
        wqkv_list.append(w)

        slab = jnp.zeros((8, PACK_COLS), jnp.float32)
        slab = slab.at[0, :D].set(p["a1"].reshape(-1))
        slab = slab.at[1, :D].set(p["b1"].reshape(-1))
        slab = slab.at[2, :D].set(p["a2"].reshape(-1))
        slab = slab.at[3, :D].set(p["b2"].reshape(-1))
        slab = slab.at[4, :D].set(p["bo"].reshape(-1))
        slab = slab.at[5, :D].set(p["bf2"].reshape(-1))
        slab = slab.at[6, :D_FF].set(p["bf1"].reshape(-1))
        bqkv = jnp.concatenate([p["bq"] * scale, p["bk"], p["bv"]],
                               axis=1).reshape(-1)
        slab = slab.at[7, :3 * D].set(bqkv)
        slabs.append(slab)

    fin = jnp.zeros((8, PACK_COLS), jnp.float32)
    fin = fin.at[0, :D].set(final_a.reshape(-1))
    fin = fin.at[1, :D].set(final_b.reshape(-1))
    slabs.append(fin)

    wqkv = jnp.stack(wqkv_list)                                   # [L, D, 128]
    wo = jnp.stack([p["wo"] for p in layer_params])               # [L, D, D]
    w1 = jnp.stack([p["w1"] for p in layer_params])               # [L, D, D_FF]
    w2 = jnp.stack([p["w2"] for p in layer_params])               # [L, D_FF, D]
    smalls = jnp.stack(slabs)                                     # [L+1, 8, 128]
    return wqkv, wo, w1, w2, smalls


@jax.jit
def encoder_pallas(x, mask, wqkv, wo, w1, w2, smalls):
    b, s, d = x.shape
    x_flat = x.reshape(b * s, d)
    kernel = functools.partial(encoder_kernel,
                               n_layers=wqkv.shape[0],
                               num_heads=NUM_HEADS, eps=EPS)
    const3 = lambda i: (0, 0, 0)   # weights: same block every step -> resident
    out = pl.pallas_call(
        kernel,
        out_shape=jax.ShapeDtypeStruct((b * s, d), x.dtype),
        grid_spec=pltpu.PrefetchScalarGridSpec(
            num_scalar_prefetch=0,
            grid=(b,),                                   # one sequence / step
            in_specs=[
                pl.BlockSpec((s, d), lambda i: (i, 0)),          # x rows
                pl.BlockSpec((1, 1, s), lambda i: (i, 0, 0)),    # mask row
                pl.BlockSpec(wqkv.shape, const3),
                pl.BlockSpec(wo.shape, const3),
                pl.BlockSpec(w1.shape, const3),
                pl.BlockSpec(w2.shape, const3),
                pl.BlockSpec(smalls.shape, const3),
            ],
            out_specs=pl.BlockSpec((s, d), lambda i: (i, 0)),
        ),
        compiler_params=pltpu.CompilerParams(
            dimension_semantics=("parallel",)),          # uses both TCs on v7x
    )(x_flat, mask, wqkv, wo, w1, w2, smalls)
    return out.reshape(b, s, d)


# ----------------------- pure-JAX reference (for checking) --------------------
def layernorm_ref(x, a, b, eps=EPS):
    mean = x.mean(-1, keepdims=True)
    xc = x - mean
    var = (xc * xc).sum(-1, keepdims=True) / (x.shape[-1] - 1)
    return a * xc / jnp.sqrt(var + eps) + b


def encoder_layer_ref(x, mask, p):
    b, s, d = x.shape
    dh = d // NUM_HEADS
    xn = layernorm_ref(x, p["a1"], p["b1"])
    q = xn @ p["wq"] + p["bq"]
    k = xn @ p["wk"] + p["bk"]
    v = xn @ p["wv"] + p["bv"]

    def split(t):
        return t.reshape(b, s, NUM_HEADS, dh).transpose(0, 2, 1, 3)

    qh, kh, vh = split(q), split(k), split(v)
    scores = jnp.einsum("bhqd,bhkd->bhqk", qh, kh) / math.sqrt(dh)
    m = mask[:, None, :, :]                       # [B,1,1,S]
    scores = jnp.where(m == 0.0, -1e9, scores)
    p_attn = jax.nn.softmax(scores, axis=-1)
    attn = jnp.einsum("bhqk,bhkd->bhqd", p_attn, vh)
    attn = attn.transpose(0, 2, 1, 3).reshape(b, s, d)
    x = x + (attn @ p["wo"] + p["bo"])
    xn2 = layernorm_ref(x, p["a2"], p["b2"])
    ff = jnp.maximum(xn2 @ p["w1"] + p["bf1"], 0.0) @ p["w2"] + p["bf2"]
    return x + ff


def encoder_ref(x, mask, layer_params, final_a, final_b):
    for p in layer_params:
        x = encoder_layer_ref(x, mask, p)
    return layernorm_ref(x, final_a, final_b)


# ---------------------------------- main --------------------------------------
if __name__ == "__main__":
    key = jax.random.PRNGKey(0)

    def init_layer(k):
        ks = jax.random.split(k, 8)
        sc = 0.1
        return {
            # LayerNorm params initialized as in the module (ones / zeros)
            "a1": jnp.ones((1, D), jnp.float32),
            "b1": jnp.zeros((1, D), jnp.float32),
            "a2": jnp.ones((1, D), jnp.float32),
            "b2": jnp.zeros((1, D), jnp.float32),
            "wq": sc * jax.random.normal(ks[0], (D, D), jnp.float32),
            "bq": sc * jax.random.normal(ks[1], (1, D), jnp.float32),
            "wk": sc * jax.random.normal(ks[2], (D, D), jnp.float32),
            "bk": sc * jax.random.normal(ks[3], (1, D), jnp.float32),
            "wv": sc * jax.random.normal(ks[4], (D, D), jnp.float32),
            "bv": sc * jax.random.normal(ks[5], (1, D), jnp.float32),
            "wo": sc * jax.random.normal(ks[6], (D, D), jnp.float32),
            "bo": jnp.zeros((1, D), jnp.float32),
            "w1": sc * jax.random.normal(ks[7], (D, D_FF), jnp.float32),
            "bf1": jnp.zeros((1, D_FF), jnp.float32),
            "w2": sc * jax.random.normal(jax.random.fold_in(k, 99),
                                         (D_FF, D), jnp.float32),
            "bf2": jnp.zeros((1, D), jnp.float32),
        }

    key, *layer_keys = jax.random.split(key, N_LAYERS + 1)
    layer_params = [init_layer(k) for k in layer_keys]
    final_a = jnp.ones((1, D), jnp.float32)
    final_b = jnp.zeros((1, D), jnp.float32)

    key, kx = jax.random.split(key)
    x = jax.random.normal(kx, (B, S, D), jnp.float32)

    # padding mask: batch 0 fully valid, batch 1 has last 3 positions masked
    lengths = jnp.array([S, S - 3], jnp.int32)
    mask = (jnp.arange(S)[None, None, :] < lengths[:, None, None]).astype(
        jnp.float32)                                  # [B, 1, S]

    wqkv, wo, w1, w2, smalls = pack_params(layer_params, final_a, final_b)

    out = encoder_pallas(x, mask, wqkv, wo, w1, w2, smalls)
    out = jax.block_until_ready(out)

    ref = encoder_ref(x, mask, layer_params, final_a, final_b)
    assert out.shape == (B, S, D)
    assert jnp.allclose(out, ref, rtol=1e-2, atol=1e-2), (
        float(jnp.max(jnp.abs(out - ref))))

    print("KERNEL_OK")
</pallas_src>

<mosaic_0001>
module attributes {stable_mosaic.version = 11 : i64} {
  func.func @encoder_kernel(%arg0: i32, %arg1: memref<8x32xf32, #tpu.memory_space<vmem>>, %arg2: memref<1x1x8xf32, #tpu.memory_space<vmem>>, %arg3: memref<2x32x128xf32, #tpu.memory_space<vmem>>, %arg4: memref<2x32x32xf32, #tpu.memory_space<vmem>>, %arg5: memref<2x32x64xf32, #tpu.memory_space<vmem>>, %arg6: memref<2x64x32xf32, #tpu.memory_space<vmem>>, %arg7: memref<3x8x128xf32, #tpu.memory_space<vmem>>, %arg8: memref<8x32xf32, #tpu.memory_space<vmem>>) attributes {dimension_semantics = [#tpu.dimension_semantics<parallel>], iteration_bounds = array<i64: 2>, scalar_prefetch = 0 : i64, scratch_operands = 0 : i64, tpu.core_type = #tpu.core_type<tc>, window_params = [{transform_indices = @transform_0, window_bounds = array<i64: 8, 32>}, {transform_indices = @transform_1, window_bounds = array<i64: 1, 1, 8>}, {pipeline_mode = #tpu.pipeline_mode<synchronous>, transform_indices = @transform_2, window_bounds = array<i64: 2, 32, 128>}, {pipeline_mode = #tpu.pipeline_mode<synchronous>, transform_indices = @transform_3, window_bounds = array<i64: 2, 32, 32>}, {pipeline_mode = #tpu.pipeline_mode<synchronous>, transform_indices = @transform_4, window_bounds = array<i64: 2, 32, 64>}, {pipeline_mode = #tpu.pipeline_mode<synchronous>, transform_indices = @transform_5, window_bounds = array<i64: 2, 64, 32>}, {pipeline_mode = #tpu.pipeline_mode<synchronous>, transform_indices = @transform_6, window_bounds = array<i64: 3, 8, 128>}, {transform_indices = @transform_7, window_bounds = array<i64: 8, 32>}]} {
    %c0 = arith.constant 0 : index
    %c0_0 = arith.constant 0 : index
    %0 = vector.load %arg1[%c0, %c0_0] : memref<8x32xf32, #tpu.memory_space<vmem>>, vector<8x32xf32>
    %c0_1 = arith.constant 0 : index
    %c0_2 = arith.constant 0 : index
    %c0_3 = arith.constant 0 : index
    %1 = vector.load %arg2[%c0_1, %c0_2, %c0_3] : memref<1x1x8xf32, #tpu.memory_space<vmem>>, vector<1x1x8xf32>
    %2 = vector.shape_cast %1 : vector<1x1x8xf32> to vector<1x8xf32>
    %cst = arith.constant 0.000000e+00 : f32
    %3 = vector.broadcast %cst : f32 to vector<1x8xf32>
    %4 = arith.cmpf one, %2, %3 : vector<1x8xf32>
    %cst_4 = arith.constant 0.000000e+00 : f32
    %cst_5 = arith.constant -1.000000e+09 : f32
    %5 = vector.broadcast %cst_4 : f32 to vector<1x8xf32>
    %6 = vector.broadcast %cst_5 : f32 to vector<1x8xf32>
    %7 = arith.select %4, %5, %6 : vector<1x8xi1>, vector<1x8xf32>
    %c0_6 = arith.constant 0 : index
    %c0_7 = arith.constant 0 : index
    %c0_8 = arith.constant 0 : index
    %8 = vector.load %arg7[%c0_6, %c0_7, %c0_8] : memref<3x8x128xf32, #tpu.memory_space<vmem>>, vector<1x8x128xf32>
    %9 = vector.shape_cast %8 : vector<1x8x128xf32> to vector<8x128xf32>
    %10 = vector.extract_strided_slice %9 {offsets = [0, 0], sizes = [1, 32], strides = [1, 1]} : vector<8x128xf32> to vector<1x32xf32>
    %11 = vector.extract_strided_slice %9 {offsets = [1, 0], sizes = [1, 32], strides = [1, 1]} : vector<8x128xf32> to vector<1x32xf32>
    %12 = vector.extract_strided_slice %9 {offsets = [2, 0], sizes = [1, 32], strides = [1, 1]} : vector<8x128xf32> to vector<1x32xf32>
    %13 = vector.extract_strided_slice %9 {offsets = [3, 0], sizes = [1, 32], strides = [1, 1]} : vector<8x128xf32> to vector<1x32xf32>
    %14 = vector.extract_strided_slice %9 {offsets = [4, 0], sizes = [1, 32], strides = [1, 1]} : vector<8x128xf32> to vector<1x32xf32>
    %15 = vector.extract_strided_slice %9 {offsets = [5, 0], sizes = [1, 32], strides = [1, 1]} : vector<8x128xf32> to vector<1x32xf32>
    %16 = vector.extract_strided_slice %9 {offsets = [6, 0], sizes = [1, 64], strides = [1, 1]} : vector<8x128xf32> to vector<1x64xf32>
    %17 = vector.extract_strided_slice %9 {offsets = [7, 0], sizes = [1, 128], strides = [1, 1]} : vector<8x128xf32> to vector<1x128xf32>
    %cst_9 = arith.constant dense<0.000000e+00> : vector<8xf32>
    %18 = vector.multi_reduction <add>, %0, %cst_9 [1] : vector<8x32xf32> to vector<8xf32>
    %19 = vector.shape_cast %18 : vector<8xf32> to vector<8x1xf32>
    %cst_10 = arith.constant 3.200000e+01 : f32
    %20 = vector.broadcast %cst_10 : f32 to vector<8x1xf32>
    %21 = arith.divf %19, %20 : vector<8x1xf32>
    %22 = vector.broadcast %21 : vector<8x1xf32> to vector<8x32xf32>
    %23 = arith.subf %0, %22 : vector<8x32xf32>
    %24 = arith.mulf %23, %23 : vector<8x32xf32>
    %cst_11 = arith.constant dense<0.000000e+00> : vector<8xf32>
    %25 = vector.multi_reduction <add>, %24, %cst_11 [1] : vector<8x32xf32> to vector<8xf32>
    %26 = vector.shape_cast %25 : vector<8xf32> to vector<8x1xf32>
    %cst_12 = arith.constant 0.0322580636 : f32
    %27 = vector.broadcast %cst_12 : f32 to vector<8x1xf32>
    %28 = arith.mulf %26, %27 : vector<8x1xf32>
    %29 = vector.broadcast %10 : vector<1x32xf32> to vector<8x32xf32>
    %30 = arith.mulf %29, %23 : vector<8x32xf32>
    %cst_13 = arith.constant 9.99999997E-7 : f32
    %31 = vector.broadcast %cst_13 : f32 to vector<8x1xf32>
    %32 = arith.addf %28, %31 : vector<8x1xf32>
    %33 = math.rsqrt %32 : vector<8x1xf32>
    %34 = vector.broadcast %33 : vector<8x1xf32> to vector<8x32xf32>
    %35 = arith.mulf %30, %34 : vector<8x32xf32>
    %36 = vector.broadcast %11 : vector<1x32xf32> to vector<8x32xf32>
    %37 = arith.addf %35, %36 : vector<8x32xf32>
    %c0_14 = arith.constant 0 : index
    %c0_15 = arith.constant 0 : index
    %c0_16 = arith.constant 0 : index
    %38 = vector.load %arg3[%c0_14, %c0_15, %c0_16] : memref<2x32x128xf32, #tpu.memory_space<vmem>>, vector<1x32x128xf32>
    %39 = vector.shape_cast %38 : vector<1x32x128xf32> to vector<32x128xf32>
    %cst_17 = arith.constant dense<0.000000e+00> : vector<8x128xf32>
    %40 = tpu.matmul %37, %39, %cst_17 {dimension_numbers = #tpu.dot_dimension_numbers<[1], [0], [0], [1], [0, 0, 1, 1], [], []>} : vector<8x32xf32>, vector<32x128xf32>, vector<8x128xf32> -> vector<8x128xf32>
    %41 = vector.broadcast %17 : vector<1x128xf32> to vector<8x128xf32>
    %42 = arith.addf %40, %41 : vector<8x128xf32>
    %43 = vector.extract_strided_slice %42 {offsets = [0, 0], sizes = [8, 32], strides = [1, 1]} : vector<8x128xf32> to vector<8x32xf32>
    %44 = vector.extract_strided_slice %42 {offsets = [0, 32], sizes = [8, 32], strides = [1, 1]} : vector<8x128xf32> to vector<8x32xf32>
    %45 = vector.extract_strided_slice %42 {offsets = [0, 64], sizes = [8, 32], strides = [1, 1]} : vector<8x128xf32> to vector<8x32xf32>
    %46 = vector.extract_strided_slice %43 {offsets = [0, 0], sizes = [8, 8], strides = [1, 1]} : vector<8x32xf32> to vector<8x8xf32>
    %47 = vector.extract_strided_slice %44 {offsets = [0, 0], sizes = [8, 8], strides = [1, 1]} : vector<8x32xf32> to vector<8x8xf32>
    %cst_18 = arith.constant dense<0.000000e+00> : vector<8x8xf32>
    %48 = tpu.matmul %46, %47, %cst_18 {dimension_numbers = #tpu.dot_dimension_numbers<[1], [1], [0], [0], [0, 0, 1, 0], [], []>} : vector<8x8xf32>, vector<8x8xf32>, vector<8x8xf32> -> vector<8x8xf32>
    %49 = vector.broadcast %7 : vector<1x8xf32> to vector<8x8xf32>
    %50 = arith.addf %48, %49 : vector<8x8xf32>
    %cst_19 = arith.constant dense<0xFF800000> : vector<8xf32>
    %51 = vector.multi_reduction <maximumf>, %50, %cst_19 [1] : vector<8x8xf32> to vector<8xf32>
    %52 = vector.shape_cast %51 : vector<8xf32> to vector<8x1xf32>
    %53 = vector.broadcast %52 : vector<8x1xf32> to vector<8x8xf32>
    %54 = arith.subf %50, %53 : vector<8x8xf32>
    %55 = math.exp %54 : vector<8x8xf32>
    %cst_20 = arith.constant dense<0.000000e+00> : vector<8xf32>
    %56 = vector.multi_reduction <add>, %55, %cst_20 [1] : vector<8x8xf32> to vector<8xf32>
    %57 = vector.shape_cast %56 : vector<8xf32> to vector<8x1xf32>
    %58 = tpu.reciprocal %57 {approx = true} : vector<8x1xf32> -> vector<8x1xf32>
    %59 = vector.broadcast %58 : vector<8x1xf32> to vector<8x8xf32>
    %60 = arith.mulf %55, %59 : vector<8x8xf32>
    %61 = vector.extract_strided_slice %45 {offsets = [0, 0], sizes = [8, 8], strides = [1, 1]} : vector<8x32xf32> to vector<8x8xf32>
    %cst_21 = arith.constant dense<0.000000e+00> : vector<8x8xf32>
    %62 = tpu.matmul %60, %61, %cst_21 {dimension_numbers = #tpu.dot_dimension_numbers<[1], [0], [0], [1], [0, 0, 1, 1], [], []>} : vector<8x8xf32>, vector<8x8xf32>, vector<8x8xf32> -> vector<8x8xf32>
    %63 = vector.extract_strided_slice %43 {offsets = [0, 8], sizes = [8, 8], strides = [1, 1]} : vector<8x32xf32> to vector<8x8xf32>
    %64 = vector.extract_strided_slice %44 {offsets = [0, 8], sizes = [8, 8], strides = [1, 1]} : vector<8x32xf32> to vector<8x8xf32>
    %cst_22 = arith.constant dense<0.000000e+00> : vector<8x8xf32>
    %65 = tpu.matmul %63, %64, %cst_22 {dimension_numbers = #tpu.dot_dimension_numbers<[1], [1], [0], [0], [0, 0, 1, 0], [], []>} : vector<8x8xf32>, vector<8x8xf32>, vector<8x8xf32> -> vector<8x8xf32>
    %66 = vector.broadcast %7 : vector<1x8xf32> to vector<8x8xf32>
    %67 = arith.addf %65, %66 : vector<8x8xf32>
    %cst_23 = arith.constant dense<0xFF800000> : vector<8xf32>
    %68 = vector.multi_reduction <maximumf>, %67, %cst_23 [1] : vector<8x8xf32> to vector<8xf32>
    %69 = vector.shape_cast %68 : vector<8xf32> to vector<8x1xf32>
    %70 = vector.broadcast %69 : vector<8x1xf32> to vector<8x8xf32>
    %71 = arith.subf %67, %70 : vector<8x8xf32>
    %72 = math.exp %71 : vector<8x8xf32>
    %cst_24 = arith.constant dense<0.000000e+00> : vector<8xf32>
    %73 = vector.multi_reduction <add>, %72, %cst_24 [1] : vector<8x8xf32> to vector<8xf32>
    %74 = vector.shape_cast %73 : vector<8xf32> to vector<8x1xf32>
    %75 = tpu.reciprocal %74 {approx = true} : vector<8x1xf32> -> vector<8x1xf32>
    %76 = vector.broadcast %75 : vector<8x1xf32> to vector<8x8xf32>
    %77 = arith.mulf %72, %76 : vector<8x8xf32>
    %78 = vector.extract_strided_slice %45 {offsets = [0, 8], sizes = [8, 8], strides = [1, 1]} : vector<8x32xf32> to vector<8x8xf32>
    %cst_25 = arith.constant dense<0.000000e+00> : vector<8x8xf32>
    %79 = tpu.matmul %77, %78, %cst_25 {dimension_numbers = #tpu.dot_dimension_numbers<[1], [0], [0], [1], [0, 0, 1, 1], [], []>} : vector<8x8xf32>, vector<8x8xf32>, vector<8x8xf32> -> vector<8x8xf32>
    %80 = vector.extract_strided_slice %43 {offsets = [0, 16], sizes = [8, 8], strides = [1, 1]} : vector<8x32xf32> to vector<8x8xf32>
    %81 = vector.extract_strided_slice %44 {offsets = [0, 16], sizes = [8, 8], strides = [1, 1]} : vector<8x32xf32> to vector<8x8xf32>
    %cst_26 = arith.constant dense<0.000000e+00> : vector<8x8xf32>
    %82 = tpu.matmul %80, %81, %cst_26 {dimension_numbers = #tpu.dot_dimension_numbers<[1], [1], [0], [0], [0, 0, 1, 0], [], []>} : vector<8x8xf32>, vector<8x8xf32>, vector<8x8xf32> -> vector<8x8xf32>
    %83 = vector.broadcast %7 : vector<1x8xf32> to vector<8x8xf32>
    %84 = arith.addf %82, %83 : vector<8x8xf32>
    %cst_27 = arith.constant dense<0xFF800000> : vector<8xf32>
    %85 = vector.multi_reduction <maximumf>, %84, %cst_27 [1] : vector<8x8xf32> to vector<8xf32>
    %86 = vector.shape_cast %85 : vector<8xf32> to vector<8x1xf32>
    %87 = vector.broadcast %86 : vector<8x1xf32> to vector<8x8xf32>
    %88 = arith.subf %84, %87 : vector<8x8xf32>
    %89 = math.exp %88 : vector<8x8xf32>
    %cst_28 = arith.constant dense<0.000000e+00> : vector<8xf32>
    %90 = vector.multi_reduction <add>, %89, %cst_28 [1] : vector<8x8xf32> to vector<8xf32>
    %91 = vector.shape_cast %90 : vector<8xf32> to vector<8x1xf32>
    %92 = tpu.reciprocal %91 {approx = true} : vector<8x1xf32> -> vector<8x1xf32>
    %93 = vector.broadcast %92 : vector<8x1xf32> to vector<8x8xf32>
    %94 = arith.mulf %89, %93 : vector<8x8xf32>
    %95 = vector.extract_strided_slice %45 {offsets = [0, 16], sizes = [8, 8], strides = [1, 1]} : vector<8x32xf32> to vector<8x8xf32>
    %cst_29 = arith.constant dense<0.000000e+00> : vector<8x8xf32>
    %96 = tpu.matmul %94, %95, %cst_29 {dimension_numbers = #tpu.dot_dimension_numbers<[1], [0], [0], [1], [0, 0, 1, 1], [], []>} : vector<8x8xf32>, vector<8x8xf32>, vector<8x8xf32> -> vector<8x8xf32>
    %97 = vector.extract_strided_slice %43 {offsets = [0, 24], sizes = [8, 8], strides = [1, 1]} : vector<8x32xf32> to vector<8x8xf32>
    %98 = vector.extract_strided_slice %44 {offsets = [0, 24], sizes = [8, 8], strides = [1, 1]} : vector<8x32xf32> to vector<8x8xf32>
    %cst_30 = arith.constant dense<0.000000e+00> : vector<8x8xf32>
    %99 = tpu.matmul %97, %98, %cst_30 {dimension_numbers = #tpu.dot_dimension_numbers<[1], [1], [0], [0], [0, 0, 1, 0], [], []>} : vector<8x8xf32>, vector<8x8xf32>, vector<8x8xf32> -> vector<8x8xf32>
    %100 = vector.broadcast %7 : vector<1x8xf32> to vector<8x8xf32>
    %101 = arith.addf %99, %100 : vector<8x8xf32>
    %cst_31 = arith.constant dense<0xFF800000> : vector<8xf32>
    %102 = vector.multi_reduction <maximumf>, %101, %cst_31 [1] : vector<8x8xf32> to vector<8xf32>
    %103 = vector.shape_cast %102 : vector<8xf32> to vector<8x1xf32>
    %104 = vector.broadcast %103 : vector<8x1xf32> to vector<8x8xf32>
    %105 = arith.subf %101, %104 : vector<8x8xf32>
    %106 = math.exp %105 : vector<8x8xf32>
    %cst_32 = arith.constant dense<0.000000e+00> : vector<8xf32>
    %107 = vector.multi_reduction <add>, %106, %cst_32 [1] : vector<8x8xf32> to vector<8xf32>
    %108 = vector.shape_cast %107 : vector<8xf32> to vector<8x1xf32>
    %109 = tpu.reciprocal %108 {approx = true} : vector<8x1xf32> -> vector<8x1xf32>
    %110 = vector.broadcast %109 : vector<8x1xf32> to vector<8x8xf32>
    %111 = arith.mulf %106, %110 : vector<8x8xf32>
    %112 = vector.extract_strided_slice %45 {offsets = [0, 24], sizes = [8, 8], strides = [1, 1]} : vector<8x32xf32> to vector<8x8xf32>
    %cst_33 = arith.constant dense<0.000000e+00> : vector<8x8xf32>
    %113 = tpu.matmul %111, %112, %cst_33 {dimension_numbers = #tpu.dot_dimension_numbers<[1], [0], [0], [1], [0, 0, 1, 1], [], []>} : vector<8x8xf32>, vector<8x8xf32>, vector<8x8xf32> -> vector<8x8xf32>
    %114 = tpu.concatenate %62, %79, %96, %113 in 1 : vector<8x8xf32>, vector<8x8xf32>, vector<8x8xf32>, vector<8x8xf32> -> vector<8x32xf32>
    %c0_34 = arith.constant 0 : index
    %c0_35 = arith.constant 0 : index
    %c0_36 = arith.constant 0 : index
    %115 = vector.load %arg4[%c0_34, %c0_35, %c0_36] : memref<2x32x32xf32, #tpu.memory_space<vmem>>, vector<1x32x32xf32>
    %116 = vector.shape_cast %115 : vector<1x32x32xf32> to vector<32x32xf32>
    %cst_37 = arith.constant dense<0.000000e+00> : vector<8x32xf32>
    %117 = tpu.matmul %114, %116, %cst_37 {dimension_numbers = #tpu.dot_dimension_numbers<[1], [0], [0], [1], [0, 0, 1, 1], [], []>} : vector<8x32xf32>, vector<32x32xf32>, vector<8x32xf32> -> vector<8x32xf32>
    %118 = arith.addf %0, %117 : vector<8x32xf32>
    %119 = vector.broadcast %14 : vector<1x32xf32> to vector<8x32xf32>
    %120 = arith.addf %118, %119 : vector<8x32xf32>
    %cst_38 = arith.constant dense<0.000000e+00> : vector<8xf32>
    %121 = vector.multi_reduction <add>, %120, %cst_38 [1] : vector<8x32xf32> to vector<8xf32>
    %122 = vector.shape_cast %121 : vector<8xf32> to vector<8x1xf32>
    %cst_39 = arith.constant 3.200000e+01 : f32
    %123 = vector.broadcast %cst_39 : f32 to vector<8x1xf32>
    %124 = arith.divf %122, %123 : vector<8x1xf32>
    %125 = vector.broadcast %124 : vector<8x1xf32> to vector<8x32xf32>
    %126 = arith.subf %120, %125 : vector<8x32xf32>
    %127 = arith.mulf %126, %126 : vector<8x32xf32>
    %cst_40 = arith.constant dense<0.000000e+00> : vector<8xf32>
    %128 = vector.multi_reduction <add>, %127, %cst_40 [1] : vector<8x32xf32> to vector<8xf32>
    %129 = vector.shape_cast %128 : vector<8xf32> to vector<8x1xf32>
    %cst_41 = arith.constant 0.0322580636 : f32
    %130 = vector.broadcast %cst_41 : f32 to vector<8x1xf32>
    %131 = arith.mulf %129, %130 : vector<8x1xf32>
    %132 = vector.broadcast %12 : vector<1x32xf32> to vector<8x32xf32>
    %133 = arith.mulf %132, %126 : vector<8x32xf32>
    %cst_42 = arith.constant 9.99999997E-7 : f32
    %134 = vector.broadcast %cst_42 : f32 to vector<8x1xf32>
    %135 = arith.addf %131, %134 : vector<8x1xf32>
    %136 = math.rsqrt %135 : vector<8x1xf32>
    %137 = vector.broadcast %136 : vector<8x1xf32> to vector<8x32xf32>
    %138 = arith.mulf %133, %137 : vector<8x32xf32>
    %139 = vector.broadcast %13 : vector<1x32xf32> to vector<8x32xf32>
    %140 = arith.addf %138, %139 : vector<8x32xf32>
    %c0_43 = arith.constant 0 : index
    %c0_44 = arith.constant 0 : index
    %c0_45 = arith.constant 0 : index
    %141 = vector.load %arg5[%c0_43, %c0_44, %c0_45] : memref<2x32x64xf32, #tpu.memory_space<vmem>>, vector<1x32x64xf32>
    %142 = vector.shape_cast %141 : vector<1x32x64xf32> to vector<32x64xf32>
    %cst_46 = arith.constant dense<0.000000e+00> : vector<8x64xf32>
    %143 = tpu.matmul %140, %142, %cst_46 {dimension_numbers = #tpu.dot_dimension_numbers<[1], [0], [0], [1], [0, 0, 1, 1], [], []>} : vector<8x32xf32>, vector<32x64xf32>, vector<8x64xf32> -> vector<8x64xf32>
    %144 = vector.broadcast %16 : vector<1x64xf32> to vector<8x64xf32>
    %145 = arith.addf %143, %144 : vector<8x64xf32>
    %cst_47 = arith.constant 0.000000e+00 : f32
    %146 = vector.broadcast %cst_47 : f32 to vector<8x64xf32>
    %147 = arith.maximumf %145, %146 : vector<8x64xf32>
    %c0_48 = arith.constant 0 : index
    %c0_49 = arith.constant 0 : index
    %c0_50 = arith.constant 0 : index
    %148 = vector.load %arg6[%c0_48, %c0_49, %c0_50] : memref<2x64x32xf32, #tpu.memory_space<vmem>>, vector<1x64x32xf32>
    %149 = vector.shape_cast %148 : vector<1x64x32xf32> to vector<64x32xf32>
    %cst_51 = arith.constant dense<0.000000e+00> : vector<8x32xf32>
    %150 = tpu.matmul %147, %149, %cst_51 {dimension_numbers = #tpu.dot_dimension_numbers<[1], [0], [0], [1], [0, 0, 1, 1], [], []>} : vector<8x64xf32>, vector<64x32xf32>, vector<8x32xf32> -> vector<8x32xf32>
    %151 = arith.addf %120, %150 : vector<8x32xf32>
    %152 = vector.broadcast %15 : vector<1x32xf32> to vector<8x32xf32>
    %153 = arith.addf %151, %152 : vector<8x32xf32>
    %c1 = arith.constant 1 : index
    %c0_52 = arith.constant 0 : index
    %c0_53 = arith.constant 0 : index
    %154 = vector.load %arg7[%c1, %c0_52, %c0_53] : memref<3x8x128xf32, #tpu.memory_space<vmem>>, vector<1x8x128xf32>
    %155 = vector.shape_cast %154 : vector<1x8x128xf32> to vector<8x128xf32>
    %156 = vector.extract_strided_slice %155 {offsets = [0, 0], sizes = [1, 32], strides = [1, 1]} : vector<8x128xf32> to vector<1x32xf32>
    %157 = vector.extract_strided_slice %155 {offsets = [1, 0], sizes = [1, 32], strides = [1, 1]} : vector<8x128xf32> to vector<1x32xf32>
    %158 = vector.extract_strided_slice %155 {offsets = [2, 0], sizes = [1, 32], strides = [1, 1]} : vector<8x128xf32> to vector<1x32xf32>
    %159 = vector.extract_strided_slice %155 {offsets = [3, 0], sizes = [1, 32], strides = [1, 1]} : vector<8x128xf32> to vector<1x32xf32>
    %160 = vector.extract_strided_slice %155 {offsets = [4, 0], sizes = [1, 32], strides = [1, 1]} : vector<8x128xf32> to vector<1x32xf32>
    %161 = vector.extract_strided_slice %155 {offsets = [5, 0], sizes = [1, 32], strides = [1, 1]} : vector<8x128xf32> to vector<1x32xf32>
    %162 = vector.extract_strided_slice %155 {offsets = [6, 0], sizes = [1, 64], strides = [1, 1]} : vector<8x128xf32> to vector<1x64xf32>
    %163 = vector.extract_strided_slice %155 {offsets = [7, 0], sizes = [1, 128], strides = [1, 1]} : vector<8x128xf32> to vector<1x128xf32>
    %cst_54 = arith.constant dense<0.000000e+00> : vector<8xf32>
    %164 = vector.multi_reduction <add>, %153, %cst_54 [1] : vector<8x32xf32> to vector<8xf32>
    %165 = vector.shape_cast %164 : vector<8xf32> to vector<8x1xf32>
    %cst_55 = arith.constant 3.200000e+01 : f32
    %166 = vector.broadcast %cst_55 : f32 to vector<8x1xf32>
    %167 = arith.divf %165, %166 : vector<8x1xf32>
    %168 = vector.broadcast %167 : vector<8x1xf32> to vector<8x32xf32>
    %169 = arith.subf %153, %168 : vector<8x32xf32>
    %170 = arith.mulf %169, %169 : vector<8x32xf32>
    %cst_56 = arith.constant dense<0.000000e+00> : vector<8xf32>
    %171 = vector.multi_reduction <add>, %170, %cst_56 [1] : vector<8x32xf32> to vector<8xf32>
    %172 = vector.shape_cast %171 : vector<8xf32> to vector<8x1xf32>
    %cst_57 = arith.constant 0.0322580636 : f32
    %173 = vector.broadcast %cst_57 : f32 to vector<8x1xf32>
    %174 = arith.mulf %172, %173 : vector<8x1xf32>
    %175 = vector.broadcast %156 : vector<1x32xf32> to vector<8x32xf32>
    %176 = arith.mulf %175, %169 : vector<8x32xf32>
    %cst_58 = arith.constant 9.99999997E-7 : f32
    %177 = vector.broadcast %cst_58 : f32 to vector<8x1xf32>
    %178 = arith.addf %174, %177 : vector<8x1xf32>
    %179 = math.rsqrt %178 : vector<8x1xf32>
    %180 = vector.broadcast %179 : vector<8x1xf32> to vector<8x32xf32>
    %181 = arith.mulf %176, %180 : vector<8x32xf32>
    %182 = vector.broadcast %157 : vector<1x32xf32> to vector<8x32xf32>
    %183 = arith.addf %181, %182 : vector<8x32xf32>
    %c1_59 = arith.constant 1 : index
    %c0_60 = arith.constant 0 : index
    %c0_61 = arith.constant 0 : index
    %184 = vector.load %arg3[%c1_59, %c0_60, %c0_61] : memref<2x32x128xf32, #tpu.memory_space<vmem>>, vector<1x32x128xf32>
    %185 = vector.shape_cast %184 : vector<1x32x128xf32> to vector<32x128xf32>
    %cst_62 = arith.constant dense<0.000000e+00> : vector<8x128xf32>
    %186 = tpu.matmul %183, %185, %cst_62 {dimension_numbers = #tpu.dot_dimension_numbers<[1], [0], [0], [1], [0, 0, 1, 1], [], []>} : vector<8x32xf32>, vector<32x128xf32>, vector<8x128xf32> -> vector<8x128xf32>
    %187 = vector.broadcast %163 : vector<1x128xf32> to vector<8x128xf32>
    %188 = arith.addf %186, %187 : vector<8x128xf32>
    %189 = vector.extract_strided_slice %188 {offsets = [0, 0], sizes = [8, 32], strides = [1, 1]} : vector<8x128xf32> to vector<8x32xf32>
    %190 = vector.extract_strided_slice %188 {offsets = [0, 32], sizes = [8, 32], strides = [1, 1]} : vector<8x128xf32> to vector<8x32xf32>
    %191 = vector.extract_strided_slice %188 {offsets = [0, 64], sizes = [8, 32], strides = [1, 1]} : vector<8x128xf32> to vector<8x32xf32>
    %192 = vector.extract_strided_slice %189 {offsets = [0, 0], sizes = [8, 8], strides = [1, 1]} : vector<8x32xf32> to vector<8x8xf32>
    %193 = vector.extract_strided_slice %190 {offsets = [0, 0], sizes = [8, 8], strides = [1, 1]} : vector<8x32xf32> to vector<8x8xf32>
    %cst_63 = arith.constant dense<0.000000e+00> : vector<8x8xf32>
    %194 = tpu.matmul %192, %193, %cst_63 {dimension_numbers = #tpu.dot_dimension_numbers<[1], [1], [0], [0], [0, 0, 1, 0], [], []>} : vector<8x8xf32>, vector<8x8xf32>, vector<8x8xf32> -> vector<8x8xf32>
    %195 = vector.broadcast %7 : vector<1x8xf32> to vector<8x8xf32>
    %196 = arith.addf %194, %195 : vector<8x8xf32>
    %cst_64 = arith.constant dense<0xFF800000> : vector<8xf32>
    %197 = vector.multi_reduction <maximumf>, %196, %cst_64 [1] : vector<8x8xf32> to vector<8xf32>
    %198 = vector.shape_cast %197 : vector<8xf32> to vector<8x1xf32>
    %199 = vector.broadcast %198 : vector<8x1xf32> to vector<8x8xf32>
    %200 = arith.subf %196, %199 : vector<8x8xf32>
    %201 = math.exp %200 : vector<8x8xf32>
    %cst_65 = arith.constant dense<0.000000e+00> : vector<8xf32>
    %202 = vector.multi_reduction <add>, %201, %cst_65 [1] : vector<8x8xf32> to vector<8xf32>
    %203 = vector.shape_cast %202 : vector<8xf32> to vector<8x1xf32>
    %204 = tpu.reciprocal %203 {approx = true} : vector<8x1xf32> -> vector<8x1xf32>
    %205 = vector.broadcast %204 : vector<8x1xf32> to vector<8x8xf32>
    %206 = arith.mulf %201, %205 : vector<8x8xf32>
    %207 = vector.extract_strided_slice %191 {offsets = [0, 0], sizes = [8, 8], strides = [1, 1]} : vector<8x32xf32> to vector<8x8xf32>
    %cst_66 = arith.constant dense<0.000000e+00> : vector<8x8xf32>
    %208 = tpu.matmul %206, %207, %cst_66 {dimension_numbers = #tpu.dot_dimension_numbers<[1], [0], [0], [1], [0, 0, 1, 1], [], []>} : vector<8x8xf32>, vector<8x8xf32>, vector<8x8xf32> -> vector<8x8xf32>
    %209 = vector.extract_strided_slice %189 {offsets = [0, 8], sizes = [8, 8], strides = [1, 1]} : vector<8x32xf32> to vector<8x8xf32>
    %210 = vector.extract_strided_slice %190 {offsets = [0, 8], sizes = [8, 8], strides = [1, 1]} : vector<8x32xf32> to vector<8x8xf32>
    %cst_67 = arith.constant dense<0.000000e+00> : vector<8x8xf32>
    %211 = tpu.matmul %209, %210, %cst_67 {dimension_numbers = #tpu.dot_dimension_numbers<[1], [1], [0], [0], [0, 0, 1, 0], [], []>} : vector<8x8xf32>, vector<8x8xf32>, vector<8x8xf32> -> vector<8x8xf32>
    %212 = vector.broadcast %7 : vector<1x8xf32> to vector<8x8xf32>
    %213 = arith.addf %211, %212 : vector<8x8xf32>
    %cst_68 = arith.constant dense<0xFF800000> : vector<8xf32>
    %214 = vector.multi_reduction <maximumf>, %213, %cst_68 [1] : vector<8x8xf32> to vector<8xf32>
    %215 = vector.shape_cast %214 : vector<8xf32> to vector<8x1xf32>
    %216 = vector.broadcast %215 : vector<8x1xf32> to vector<8x8xf32>
    %217 = arith.subf %213, %216 : vector<8x8xf32>
    %218 = math.exp %217 : vector<8x8xf32>
    %cst_69 = arith.constant dense<0.000000e+00> : vector<8xf32>
    %219 = vector.multi_reduction <add>, %218, %cst_69 [1] : vector<8x8xf32> to vector<8xf32>
    %220 = vector.shape_cast %219 : vector<8xf32> to vector<8x1xf32>
    %221 = tpu.reciprocal %220 {approx = true} : vector<8x1xf32> -> vector<8x1xf32>
    %222 = vector.broadcast %221 : vector<8x1xf32> to vector<8x8xf32>
    %223 = arith.mulf %218, %222 : vector<8x8xf32>
    %224 = vector.extract_strided_slice %191 {offsets = [0, 8], sizes = [8, 8], strides = [1, 1]} : vector<8x32xf32> to vector<8x8xf32>
    %cst_70 = arith.constant dense<0.000000e+00> : vector<8x8xf32>
    %225 = tpu.matmul %223, %224, %cst_70 {dimension_numbers = #tpu.dot_dimension_numbers<[1], [0], [0], [1], [0, 0, 1, 1], [], []>} : vector<8x8xf32>, vector<8x8xf32>, vector<8x8xf32> -> vector<8x8xf32>
    %226 = vector.extract_strided_slice %189 {offsets = [0, 16], sizes = [8, 8], strides = [1, 1]} : vector<8x32xf32> to vector<8x8xf32>
    %227 = vector.extract_strided_slice %190 {offsets = [0, 16], sizes = [8, 8], strides = [1, 1]} : vector<8x32xf32> to vector<8x8xf32>
    %cst_71 = arith.constant dense<0.000000e+00> : vector<8x8xf32>
    %228 = tpu.matmul %226, %227, %cst_71 {dimension_numbers = #tpu.dot_dimension_numbers<[1], [1], [0], [0], [0, 0, 1, 0], [], []>} : vector<8x8xf32>, vector<8x8xf32>, vector<8x8xf32> -> vector<8x8xf32>
    %229 = vector.broadcast %7 : vector<1x8xf32> to vector<8x8xf32>
    %230 = arith.addf %228, %229 : vector<8x8xf32>
    %cst_72 = arith.constant dense<0xFF800000> : vector<8xf32>
    %231 = vector.multi_reduction <maximumf>, %230, %cst_72 [1] : vector<8x8xf32> to vector<8xf32>
    %232 = vector.shape_cast %231 : vector<8xf32> to vector<8x1xf32>
    %233 = vector.broadcast %232 : vector<8x1xf32> to vector<8x8xf32>
    %234 = arith.subf %230, %233 : vector<8x8xf32>
    %235 = math.exp %234 : vector<8x8xf32>
    %cst_73 = arith.constant dense<0.000000e+00> : vector<8xf32>
    %236 = vector.multi_reduction <add>, %235, %cst_73 [1] : vector<8x8xf32> to vector<8xf32>
    %237 = vector.shape_cast %236 : vector<8xf32> to vector<8x1xf32>
    %238 = tpu.reciprocal %237 {approx = true} : vector<8x1xf32> -> vector<8x1xf32>
    %239 = vector.broadcast %238 : vector<8x1xf32> to vector<8x8xf32>
    %240 = arith.mulf %235, %239 : vector<8x8xf32>
    %241 = vector.extract_strided_slice %191 {offsets = [0, 16], sizes = [8, 8], strides = [1, 1]} : vector<8x32xf32> to vector<8x8xf32>
    %cst_74 = arith.constant dense<0.000000e+00> : vector<8x8xf32>
    %242 = tpu.matmul %240, %241, %cst_74 {dimension_numbers = #tpu.dot_dimension_numbers<[1], [0], [0], [1], [0, 0, 1, 1], [], []>} : vector<8x8xf32>, vector<8x8xf32>, vector<8x8xf32> -> vector<8x8xf32>
    %243 = vector.extract_strided_slice %189 {offsets = [0, 24], sizes = [8, 8], strides = [1, 1]} : vector<8x32xf32> to vector<8x8xf32>
    %244 = vector.extract_strided_slice %190 {offsets = [0, 24], sizes = [8, 8], strides = [1, 1]} : vector<8x32xf32> to vector<8x8xf32>
    %cst_75 = arith.constant dense<0.000000e+00> : vector<8x8xf32>
    %245 = tpu.matmul %243, %244, %cst_75 {dimension_numbers = #tpu.dot_dimension_numbers<[1], [1], [0], [0], [0, 0, 1, 0], [], []>} : vector<8x8xf32>, vector<8x8xf32>, vector<8x8xf32> -> vector<8x8xf32>
    %246 = vector.broadcast %7 : vector<1x8xf32> to vector<8x8xf32>
    %247 = arith.addf %245, %246 : vector<8x8xf32>
    %cst_76 = arith.constant dense<0xFF800000> : vector<8xf32>
    %248 = vector.multi_reduction <maximumf>, %247, %cst_76 [1] : vector<8x8xf32> to vector<8xf32>
    %249 = vector.shape_cast %248 : vector<8xf32> to vector<8x1xf32>
    %250 = vector.broadcast %249 : vector<8x1xf32> to vector<8x8xf32>
    %251 = arith.subf %247, %250 : vector<8x8xf32>
    %252 = math.exp %251 : vector<8x8xf32>
    %cst_77 = arith.constant dense<0.000000e+00> : vector<8xf32>
    %253 = vector.multi_reduction <add>, %252, %cst_77 [1] : vector<8x8xf32> to vector<8xf32>
    %254 = vector.shape_cast %253 : vector<8xf32> to vector<8x1xf32>
    %255 = tpu.reciprocal %254 {approx = true} : vector<8x1xf32> -> vector<8x1xf32>
    %256 = vector.broadcast %255 : vector<8x1xf32> to vector<8x8xf32>
    %257 = arith.mulf %252, %256 : vector<8x8xf32>
    %258 = vector.extract_strided_slice %191 {offsets = [0, 24], sizes = [8, 8], strides = [1, 1]} : vector<8x32xf32> to vector<8x8xf32>
    %cst_78 = arith.constant dense<0.000000e+00> : vector<8x8xf32>
    %259 = tpu.matmul %257, %258, %cst_78 {dimension_numbers = #tpu.dot_dimension_numbers<[1], [0], [0], [1], [0, 0, 1, 1], [], []>} : vector<8x8xf32>, vector<8x8xf32>, vector<8x8xf32> -> vector<8x8xf32>
    %260 = tpu.concatenate %208, %225, %242, %259 in 1 : vector<8x8xf32>, vector<8x8xf32>, vector<8x8xf32>, vector<8x8xf32> -> vector<8x32xf32>
    %c1_79 = arith.constant 1 : index
    %c0_80 = arith.constant 0 : index
    %c0_81 = arith.constant 0 : index
    %261 = vector.load %arg4[%c1_79, %c0_80, %c0_81] : memref<2x32x32xf32, #tpu.memory_space<vmem>>, vector<1x32x32xf32>
    %262 = vector.shape_cast %261 : vector<1x32x32xf32> to vector<32x32xf32>
    %cst_82 = arith.constant dense<0.000000e+00> : vector<8x32xf32>
    %263 = tpu.matmul %260, %262, %cst_82 {dimension_numbers = #tpu.dot_dimension_numbers<[1], [0], [0], [1], [0, 0, 1, 1], [], []>} : vector<8x32xf32>, vector<32x32xf32>, vector<8x32xf32> -> vector<8x32xf32>
    %264 = arith.addf %153, %263 : vector<8x32xf32>
    %265 = vector.broadcast %160 : vector<1x32xf32> to vector<8x32xf32>
    %266 = arith.addf %264, %265 : vector<8x32xf32>
    %cst_83 = arith.constant dense<0.000000e+00> : vector<8xf32>
    %267 = vector.multi_reduction <add>, %266, %cst_83 [1] : vector<8x32xf32> to vector<8xf32>
    %268 = vector.shape_cast %267 : vector<8xf32> to vector<8x1xf32>
    %cst_84 = arith.constant 3.200000e+01 : f32
    %269 = vector.broadcast %cst_84 : f32 to vector<8x1xf32>
    %270 = arith.divf %268, %269 : vector<8x1xf32>
    %271 = vector.broadcast %270 : vector<8x1xf32> to vector<8x32xf32>
    %272 = arith.subf %266, %271 : vector<8x32xf32>
    %273 = arith.mulf %272, %272 : vector<8x32xf32>
    %cst_85 = arith.constant dense<0.000000e+00> : vector<8xf32>
    %274 = vector.multi_reduction <add>, %273, %cst_85 [1] : vector<8x32xf32> to vector<8xf32>
    %275 = vector.shape_cast %274 : vector<8xf32> to vector<8x1xf32>
    %cst_86 = arith.constant 0.0322580636 : f32
    %276 = vector.broadcast %cst_86 : f32 to vector<8x1xf32>
    %277 = arith.mulf %275, %276 : vector<8x1xf32>
    %278 = vector.broadcast %158 : vector<1x32xf32> to vector<8x32xf32>
    %279 = arith.mulf %278, %272 : vector<8x32xf32>
    %cst_87 = arith.constant 9.99999997E-7 : f32
    %280 = vector.broadcast %cst_87 : f32 to vector<8x1xf32>
    %281 = arith.addf %277, %280 : vector<8x1xf32>
    %282 = math.rsqrt %281 : vector<8x1xf32>
    %283 = vector.broadcast %282 : vector<8x1xf32> to vector<8x32xf32>
    %284 = arith.mulf %279, %283 : vector<8x32xf32>
    %285 = vector.broadcast %159 : vector<1x32xf32> to vector<8x32xf32>
    %286 = arith.addf %284, %285 : vector<8x32xf32>
    %c1_88 = arith.constant 1 : index
    %c0_89 = arith.constant 0 : index
    %c0_90 = arith.constant 0 : index
    %287 = vector.load %arg5[%c1_88, %c0_89, %c0_90] : memref<2x32x64xf32, #tpu.memory_space<vmem>>, vector<1x32x64xf32>
    %288 = vector.shape_cast %287 : vector<1x32x64xf32> to vector<32x64xf32>
    %cst_91 = arith.constant dense<0.000000e+00> : vector<8x64xf32>
    %289 = tpu.matmul %286, %288, %cst_91 {dimension_numbers = #tpu.dot_dimension_numbers<[1], [0], [0], [1], [0, 0, 1, 1], [], []>} : vector<8x32xf32>, vector<32x64xf32>, vector<8x64xf32> -> vector<8x64xf32>
    %290 = vector.broadcast %162 : vector<1x64xf32> to vector<8x64xf32>
    %291 = arith.addf %289, %290 : vector<8x64xf32>
    %cst_92 = arith.constant 0.000000e+00 : f32
    %292 = vector.broadcast %cst_92 : f32 to vector<8x64xf32>
    %293 = arith.maximumf %291, %292 : vector<8x64xf32>
    %c1_93 = arith.constant 1 : index
    %c0_94 = arith.constant 0 : index
    %c0_95 = arith.constant 0 : index
    %294 = vector.load %arg6[%c1_93, %c0_94, %c0_95] : memref<2x64x32xf32, #tpu.memory_space<vmem>>, vector<1x64x32xf32>
    %295 = vector.shape_cast %294 : vector<1x64x32xf32> to vector<64x32xf32>
    %cst_96 = arith.constant dense<0.000000e+00> : vector<8x32xf32>
    %296 = tpu.matmul %293, %295, %cst_96 {dimension_numbers = #tpu.dot_dimension_numbers<[1], [0], [0], [1], [0, 0, 1, 1], [], []>} : vector<8x64xf32>, vector<64x32xf32>, vector<8x32xf32> -> vector<8x32xf32>
    %297 = arith.addf %266, %296 : vector<8x32xf32>
    %298 = vector.broadcast %161 : vector<1x32xf32> to vector<8x32xf32>
    %299 = arith.addf %297, %298 : vector<8x32xf32>
    %c2 = arith.constant 2 : index
    %c0_97 = arith.constant 0 : index
    %c0_98 = arith.constant 0 : index
    %300 = vector.load %arg7[%c2, %c0_97, %c0_98] : memref<3x8x128xf32, #tpu.memory_space<vmem>>, vector<1x8x128xf32>
    %301 = vector.shape_cast %300 : vector<1x8x128xf32> to vector<8x128xf32>
    %302 = vector.extract_strided_slice %301 {offsets = [0, 0], sizes = [1, 32], strides = [1, 1]} : vector<8x128xf32> to vector<1x32xf32>
    %303 = vector.extract_strided_slice %301 {offsets = [1, 0], sizes = [1, 32], strides = [1, 1]} : vector<8x128xf32> to vector<1x32xf32>
    %cst_99 = arith.constant dense<0.000000e+00> : vector<8xf32>
    %304 = vector.multi_reduction <add>, %299, %cst_99 [1] : vector<8x32xf32> to vector<8xf32>
    %305 = vector.shape_cast %304 : vector<8xf32> to vector<8x1xf32>
    %cst_100 = arith.constant 3.200000e+01 : f32
    %306 = vector.broadcast %cst_100 : f32 to vector<8x1xf32>
    %307 = arith.divf %305, %306 : vector<8x1xf32>
    %308 = vector.broadcast %307 : vector<8x1xf32> to vector<8x32xf32>
    %309 = arith.subf %299, %308 : vector<8x32xf32>
    %310 = arith.mulf %309, %309 : vector<8x32xf32>
    %cst_101 = arith.constant dense<0.000000e+00> : vector<8xf32>
    %311 = vector.multi_reduction <add>, %310, %cst_101 [1] : vector<8x32xf32> to vector<8xf32>
    %312 = vector.shape_cast %311 : vector<8xf32> to vector<8x1xf32>
    %cst_102 = arith.constant 0.0322580636 : f32
    %313 = vector.broadcast %cst_102 : f32 to vector<8x1xf32>
    %314 = arith.mulf %312, %313 : vector<8x1xf32>
    %315 = vector.broadcast %302 : vector<1x32xf32> to vector<8x32xf32>
    %316 = arith.mulf %315, %309 : vector<8x32xf32>
    %cst_103 = arith.constant 9.99999997E-7 : f32
    %317 = vector.broadcast %cst_103 : f32 to vector<8x1xf32>
    %318 = arith.addf %314, %317 : vector<8x1xf32>
    %319 = math.rsqrt %318 : vector<8x1xf32>
    %320 = vector.broadcast %319 : vector<8x1xf32> to vector<8x32xf32>
    %321 = arith.mulf %316, %320 : vector<8x32xf32>
    %322 = vector.broadcast %303 : vector<1x32xf32> to vector<8x32xf32>
    %323 = arith.addf %321, %322 : vector<8x32xf32>
    %c0_104 = arith.constant 0 : index
    %c0_105 = arith.constant 0 : index
    %324 = vector.load %arg8[%c0_104, %c0_105] : memref<8x32xf32, #tpu.memory_space<vmem>>, vector<8x32xf32>
    tpu.vector_store %arg8[%c0_104, %c0_105], %323 {strides = array<i32>} : memref<8x32xf32, #tpu.memory_space<vmem>>, vector<8x32xf32>,
    return
  }
  func.func @transform_0(%arg0: i32) -> (i32, i32) {
    %c0_i32 = arith.constant 0 : i32
    %c0_i32_0 = arith.constant 0 : i32
    return %arg0, %c0_i32 : i32, i32
  }
  func.func @transform_1(%arg0: i32) -> (i32, i32, i32) {
    %c0_i32 = arith.constant 0 : i32
    %c0_i32_0 = arith.constant 0 : i32
    %c0_i32_1 = arith.constant 0 : i32
    return %arg0, %c0_i32, %c0_i32_0 : i32, i32, i32
  }
  func.func @transform_2(%arg0: i32) -> (i32, i32, i32) {
    %c0_i32 = arith.constant 0 : i32
    %c0_i32_0 = arith.constant 0 : i32
    %c0_i32_1 = arith.constant 0 : i32
    %c0_i32_2 = arith.constant 0 : i32
    return %c0_i32, %c0_i32_0, %c0_i32_1 : i32, i32, i32
  }
  func.func @transform_3(%arg0: i32) -> (i32, i32, i32) {
    %c0_i32 = arith.constant 0 : i32
    %c0_i32_0 = arith.constant 0 : i32
    %c0_i32_1 = arith.constant 0 : i32
    %c0_i32_2 = arith.constant 0 : i32
    return %c0_i32, %c0_i32_0, %c0_i32_1 : i32, i32, i32
  }
  func.func @transform_4(%arg0: i32) -> (i32, i32, i32) {
    %c0_i32 = arith.constant 0 : i32
    %c0_i32_0 = arith.constant 0 : i32
    %c0_i32_1 = arith.constant 0 : i32
    %c0_i32_2 = arith.constant 0 : i32
    return %c0_i32, %c0_i32_0, %c0_i32_1 : i32, i32, i32
  }
  func.func @transform_5(%arg0: i32) -> (i32, i32, i32) {
    %c0_i32 = arith.constant 0 : i32
    %c0_i32_0 = arith.constant 0 : i32
    %c0_i32_1 = arith.constant 0 : i32
    %c0_i32_2 = arith.constant 0 : i32
    return %c0_i32, %c0_i32_0, %c0_i32_1 : i32, i32, i32
  }
  func.func @transform_6(%arg0: i32) -> (i32, i32, i32) {
    %c0_i32 = arith.constant 0 : i32
    %c0_i32_0 = arith.constant 0 : i32
    %c0_i32_1 = arith.constant 0 : i32
    %c0_i32_2 = arith.constant 0 : i32
    return %c0_i32, %c0_i32_0, %c0_i32_1 : i32, i32, i32
  }
  func.func @transform_7(%arg0: i32) -> (i32, i32) {
    %c0_i32 = arith.constant 0 : i32
    %c0_i32_0 = arith.constant 0 : i32
    return %arg0, %c0_i32 : i32, i32
  }
}

</mosaic_0001>

<bundles_post_ra>
// kernel: encoder_pallas.1
= control target key start
LH: loop header
LB: loop body
LE: loop exit
PB: predicated region body
PF: predicated region fallthrough
CT: control target
= control target key end

     0   :  { %s2297_s0 = inlined_call_operand.hbm [shape: f32[16,32], index: 0, kind: input, shape index: {}]   ;;  %s2298_s1 = inlined_call_operand.hbm [shape: f32[2,1,8], index: 1, kind: input, shape index: {}]   ;;  %s2299_s2 = inlined_call_operand.vmem [shape: f32[2,32,128], index: 2, kind: input, shape index: {}]   ;;  %s2300_s3 = inlined_call_operand.vmem [shape: f32[2,32,32], index: 3, kind: input, shape index: {}]   ;;  %s2301_s4 = inlined_call_operand.vmem [shape: f32[2,32,64], index: 4, kind: input, shape index: {}]   ;;  %s2302_s5 = inlined_call_operand.vmem [shape: f32[2,64,32], index: 5, kind: input, shape index: {}]   ;;  %s2303_s6 = inlined_call_operand.hbm [shape: f32[3,8,128], index: 6, kind: input, shape index: {}]   ;;  %s2304_s7 = inlined_call_operand.hbm [shape: f32[16,32], index: 7, kind: output, shape index: {}]  }
   0x1   :  { %2316 = sst [smem:[#allocation18_spill]] %s2303_s6 }
   0x2   :  { %12 = vsyncpa [#allocation3], 0 }
   0x3   :  { %14 = vsyncpa [#allocation3 + $0x1], 0 }
   0x4   :  { %15 = vsyncpa [#allocation6], 0 }
   0x5   :  { %17 = vsyncpa [#allocation6 + $0x1], 0 }
   0x6   :  { %18 = vsyncpa [#allocation4], 0 }
   0x7   :  { %20 = vsyncpa [#allocation4 + $0x1], 0  ;;  %s1825_s24 = smov 0   ;;  %s1827_s25 = smov 0  }
   0x8   :  { %s1829_s26 = smov 0   ;;  %s1831_s27 = smov 0  }
   0x9 LB: > { %2317 = sst [smem:[#allocation13_spill]] %s1760_s26  ;;  %s1849_s8 = sadd.s32 4294967295, %s1764_s27   ;;  %s1764_s27 = sphi %s1831_s27, %s2338_s27   ;;  %s1760_s26 = sphi %s1829_s26, %s2340_s26   ;;  %s1756_s25 = sphi %s1827_s25, %s2342_s25   ;;  %s1752_s24 = sphi %s1825_s24, %s2341_s24  }
   0xa   : > { %2318 = sst [smem:[#allocation14_spill]] %s1764_s27  ;;  %p1411_p0 = scmp.ge.s32.totalorder %s1764_s27, 1 }
   0xb   : > { %s2319_s6 = sld [smem:[#allocation18_spill]]  ;;  %p47_p1 = scmp.eq.s32.totalorder %s1849_s8, 0 }
   0xc   : > { %p214_p2 = scmp.lt.s32.totalorder %s1764_s27, 3  ;;  %s1766_s10 = smov [#allocation7]  }
   0xd   : > { %s239_s11 = sshll.u32 %s1766_s10, 4  ;;  %s1767_s12 = smov 128   ;;  %s240_s11 = int_to_ptr.vmem [resolvable:$true] %s239_s11 }
   0xe   : > { %p1854_p3 = pnand %p1411_p0, %p214_p2  ;;  %s1768_s13 = smov 8  }
   0xf   : > { %s1410_s14 = sadd.s32 4294967294, %s1764_s27   ;;  %s1865_s15 = sadd.s32 1, %s1764_s27  }
  0x10   : > { %p1486_p4 = pneg %p1854_p3  ;;  %2321 = sst [smem:[#allocation15_spill]] %s1865_s15 }
  0x11   : > { %s237_s30 = sshll.u32 %s2319_s6, 4  ;;  %s33_s16 = sadd.s32 1, %s1760_s26  ;;  %s238_s30 = int_to_ptr.hbm [resolvable:$true] %s237_s30 }
  0x12   : > { %p1487_p6 = pnand %p1486_p4, %p47_p1  ;;  %s30_s17 = ssub.s32 %s1764_s27, %s1865_s15 }
  0x13   : > { %p40_p7 = scmp.ne.s32.totalorder %s1760_s26, %s1756_s25  ;;  %p31_p8 = scmp.eq.s32.totalorder %s30_s17, 0 }
  0x14   : > { %1489 = dma.hbm_to_vmem [thread:$0]  (!%p1487_p6), %s238_s30, 384, %s240_s11, [#allocation6], %s1767_s12, %s1767_s12, %s1768_s13  }
  0x15   : > { %p41_p9 = scmp.eq.s32.totalorder %s1764_s27, 0  ;;  %p46_p10 = scmp.ne.s32.totalorder %s1756_s25, %s1752_s24 }
  0x16   : > { %p201_p11 = scmp.eq.s32.totalorder %s1849_s8, 1  ;;  %p207_p2 = scmp.eq.s32.totalorder %s1410_s14, 1 }
  0x17   : > { %s1877_s18 = scalar_select %p31_p8, %s1760_s26, %s33_s16  }
  0x18   : > { %p1879_p12 = por %p41_p9, %p40_p7  ;;  %p1885_p13 = por %p47_p1, %p46_p10 }
  0x19   : > { %2322 = sst [smem:[#allocation16_spill]] %s1877_s18  ;;  %p1889_p0 = por %p201_p11, %p40_p7 }
  0x1a   : > { %p1502_p4 = scmp.lt.s32.totalorder %s1764_s27, 2  ;;  %s1895_s22 = sand.u32 1, %s1760_s26  }
  0x1b   : > { %p1897_p6 = por %p207_p2, %p46_p10  ;;  %s1414_s28 = sshll.u32 %s1895_s22, 3 }
  0x1c   : > { %s1415_s29 = sshll.u32 %s1764_s27, 3  ;;  %s257_s13 = scalar_lea.vmem [#allocation2], %s1414_s28 }
  0x1d   : > { %s2326_s23 = scalar_select %p1897_p6, 1, 0 }
  0x1e   : > { %s261_s11 = scalar_lea.hbm %s2297_s0, %s1415_s29  ;;  %s265_s16 = sshll.u32 %s257_s13, 4  ;;  %s266_s16 = int_to_ptr.vmem [resolvable:$true] %s265_s16 }
  0x1f   : > { %2327 = sst [smem:[#allocation17_spill]] %s2326_s23  ;;  %s263_s12 = sshll.u32 %s261_s11, 4  ;;  %s264_s12 = int_to_ptr.hbm [resolvable:$true] %s263_s12 }
  0x20   : > { %p1908_p7 = pnand %p1502_p4, %p1879_p12  ;;  %s272_s17 = sand.u32 1, %s1764_s27  }
  0x21   : > { %s278_s26 = scalar_lea.hbm %s2298_s1, %s1764_s27  ;;  %s254_s15 = scalar_lea.sflag [#allocation3], %s1895_s22 }
  0x22   : > { %s1630_s30 = sshra.s32 %s264_s12, 4  ;;  %p1634_p9 = pneg %p1908_p7  ;;  %s1631_s30 = int_to_ptr.hbm [resolvable:$true] %s1630_s30 }
  0x23   : > { %s1632_s29 = scalar_lea.hbm %s1631_s30, 8  ;;  %s1637_s10 = scalar_lea.hbm %s2297_s0, 16 }
  0x24   : > { %p1633_p8 = scmp.ne.s32.totalorder %s1631_s30, %s1632_s29  ;;  %p1638_p12 = scmp.lt.s32.totalorder %s1631_s30, %s2297_s0 }
  0x25   : > { %p1639_p2 = scmp.lt.s32.totalorder %s1637_s10, %s1632_s29 }
  0x26   : > { %p1635_p10 = pnand %p1634_p9, %p1633_p8 }
  0x27   : > { %p1640_p4 = por %p1639_p2, %p1638_p12 }
  0x28   : > { %p1636_p11 = pneg %p1635_p10 }
  0x2a   : > { %p1641_p5 = pnand %p1640_p4, %p1636_p11 }
  0x2c   : > { %1644 = shalt.err (!%p1641_p5)
}
  0x2d   : > { %1493 = dma.hbm_to_vmem [thread:$0]  (!%p1908_p7), %s264_s12, 128, %s266_s16, %s254_s15  }
  0x2e   : > { %s280_s6 = sshll.u32 %s278_s26, 4  ;;  %s275_s18 = scalar_lea.vmem [#allocation5], %s1895_s22  ;;  %s281_s6 = int_to_ptr.hbm [resolvable:$true] %s280_s6 }
  0x2f   : > { %s282_s27 = sshll.u32 %s275_s18, 4  ;;  %s273_s19 = scalar_lea.sflag [#allocation6], %s272_s17  ;;  %s283_s27 = int_to_ptr.vmem [resolvable:$true] %s282_s27 }
  0x30   : > { %s1660_s28 = sshra.s32 %s281_s6, 4  ;;  %s1667_s10 = scalar_lea.hbm %s2298_s1, 2  ;;  %s1661_s28 = int_to_ptr.hbm [resolvable:$true] %s1660_s28 }
  0x31   : > { %s1662_s23 = scalar_lea.hbm %s1661_s28, 1  ;;  %p1668_p5 = scmp.lt.s32.totalorder %s1661_s28, %s2298_s1 }
  0x32   : > { %p1663_p8 = scmp.ne.s32.totalorder %s1661_s28, %s1662_s23  ;;  %p1669_p12 = scmp.lt.s32.totalorder %s1667_s10, %s1662_s23 }
  0x34   : > { %p1665_p10 = pnand %p1663_p8, %p1634_p9  ;;  %p1670_p2 = por %p1669_p12, %p1668_p5 }
  0x36   : > { %p1666_p11 = pneg %p1665_p10 }
  0x38   : > { %p1671_p4 = pnand %p1670_p2, %p1666_p11 }
  0x3a   : > { %1674 = shalt.err (!%p1671_p4)
}
  0x3b   : > { %1496 = dma.hbm_to_vmem [thread:$0]  (!%p1908_p7), %s281_s6, 16, %s283_s27, %s273_s19  }
  0x3c   : > { %291 = sbr.rel (%p1854_p3) target bundleno = 4784 (0x12b0), region = 48  ;;  %s1946_s26 = sand.u32 (!%p1854_p3), 1, %s1756_s25  }
  0x3d   : > { %s2310_s22 = sshll.u32 (!%p1854_p3), %s1946_s26, 3  ;;  %s294_s12 = scalar_lea.sflag (!%p1854_p3), [#allocation3], %s1946_s26 }
  0x3e   : > { %s297_s23 = scalar_lea.vmem (!%p1854_p3), [#allocation2], %s2310_s22 }
  0x41   : > { %1735 = dma.done.wait (%p1885_p13), %s294_s12, 128  }
  0x42   : > { %1737 = vsyncadd (%p1885_p13), %s294_s12, 4294967168  ;;  %s303_s27 = sand.u32 1, %s1849_s8   ;;  %s306_s16 = scalar_lea.vmem [#allocation5], %s1946_s26 }
  0x43   : > { %s304_s9 = scalar_lea.sflag [#allocation6], %s303_s27 }
  0x44   : > { %1739 = dma.done.wait (%p1885_p13), %s304_s9, 16  }
  0x45   : > { %1741 = vsyncadd (%p1885_p13), %s304_s9, 4294967280 }
  0x46   : > { %1743 = dma.done.wait (%p47_p1), [#allocation6], 384  }
  0x47   : > { %1745 = vsyncadd (%p47_p1), [#allocation6], 4294966912  ;;  %vm352_vm0 = vcmask 261120   ;;  %v1966_v0 = vld [vmem:[%s297_s23] sm:$0xff]  ;;  %v1769_v2 = vmov 32.0   ;;  %v389_v14 = vld [vmem:[%s2299_s2 + $0x18] sm:$0xff] }
  0x48   : > { %v353_v1 = vsel %vm352_vm0, %v1966_v0, 0.0  ;;  %1556 = vrcp.f32 %v1769_v2  ;;  %406 = vmatpush.msra.mxu0 %v389_v14  ;;  %v388_v15 = vld [vmem:[%s2299_s2 + $0x10] sm:$0xff]  ;;  %v387_v16 = vld [vmem:[%s2299_s2 + $0x8] sm:$0xff]  ;;  %v386_v17 = vld [vmem:[%s2299_s2] sm:$0xff]  ;;  %s1770_s30 = smov 88   ;;  %s1771_s29 = smov 64  }
  0x49   : > { %354 = vadd.xlane.f32.xlu0 %v353_v1  ;;  %v1987_v23 = vld [vmem:[#allocation7] sm:$0xff]  ;;  %s1772_s10 = smov 96   ;;  %s1773_s11 = smov 80   ;;  %vm420_vm5 = vcmask 64512   ;;  %v348_v44 = vld [vmem:[%s306_s16] sm:$0x1] }
  0x4a   : > { %407 = vmatpush.msra.mxu0 %v388_v15  ;;  %v370_v26 = vperm.slane %v1987_v23, 0  ;;  %v384_v30 = vperm.slane %v1987_v23, 1  ;;  %v390_v34 = vperm.slane %v1987_v23, 7  ;;  %s1774_s15 = smov 120   ;;  %s1775_s12 = smov 112   ;;  %vm349_vm6 = vcmp.ne.f32.partialorder %v348_v44, 0.0 }
  0x4b   : > { %s1776_s23 = smov 72   ;;  %v1777_v45 = vmov -1e+09   ;;  %s2313_s27 = smov 48   ;;  %vm690_vm7 = vcmask 130048   ;;  %vm692_vm8 = vcmask 195584  }
  0x4c   : > { %408 = vmatpush.msra.mxu0 %v387_v16  ;;  %v350_v46 = vsel %vm349_vm6, 0.0, %v1777_v45  ;;  %s1779_s9 = smov 104   ;;  %s2315_s16 = smov 40   ;;  %vm787_vm12 = vcmask 523264  }
  0x4d   : > { %v2018_v47 = vperm.slane %v350_v46, 0  ;;  %s1781_s20 = smov 56   ;;  %s2311_s14 = smov 16  }
  0x4e   : > { %v1557_v3 = vpop.eup %1556  ;;  %409 = vmatpush.msra.mxu0 %v386_v17  ;;  %s2312_s17 = smov 8   ;;  %s2314_s13 = smov 24  }
  0x4f   : > { %v357_v4 = vmul.f32 32.0, %v1557_v3  ;;  %vm361_vm1 = vweird.f32 %v1557_v3  ;;  %s1710_s6 = scalar_lea.hbm %s2304_s7, 16 }
  0x51   : > { %v358_v5 = vsub.f32 1.0, %v357_v4 }
  0x53   : > { %v359_v6 = vmul.f32 %v1557_v3, %v358_v5 }
  0x55   : > { %v360_v7 = vadd.f32 %v1557_v3, %v359_v6 }
  0x57   : > { %v1970_v8 = vsel %vm361_vm1, %v1557_v3, %v360_v7 }
  0xbc   : > { %v355_v9 = vpop.xlane.xlu0 %354 }
  0xbd   : > { %v363_v10 = vmul.f32 %v1970_v8, %v355_v9 }
  0xbf   : > { %v364_v11 = vsub.f32 %v1966_v0, %v363_v10 }
  0xc1   : > { %v365_v12 = vmul.f32 %v364_v11, %v364_v11  ;;  %v371_v29 = vmul.f32 %v370_v26, %v364_v11 }
  0xc3   : > { %v366_v13 = vsel %vm352_vm0, %v365_v12, 0.0 }
  0xc4   : > { %367 = vadd.xlane.f32.xlu0 %v366_v13 }
 0x137   : > { %v368_v18 = vpop.xlane.xlu0 %367 }
 0x138   : > { %v369_v19 = vmul.f32 0.032258064, %v368_v18 }
 0x13a   : > { %v372_v20 = vadd.f32 1e-06, %v369_v19 }
 0x13c   : > { %1558 = vrsqrt.f32 %v372_v20  ;;  %vm379_vm3 = vweird.f32 %v372_v20 }
 0x142   : > { %v1559_v21 = vpop.eup %1558 }
 0x143   : > { %v374_v22 = vmul.f32 %v1559_v21, %v372_v20  ;;  %vm380_vm2 = vweird.f32 %v1559_v21 }
 0x144   : > { %vm381_vm4 = vmor %vm379_vm3, %vm380_vm2 }
 0x145   : > { %v375_v24 = vmul.f32 %v1559_v21, %v374_v22 }
 0x147   : > { %v376_v25 = vmul.f32 0.5, %v375_v24 }
 0x149   : > { %v377_v27 = vsub.f32 1.5, %v376_v25 }
 0x14b   : > { %v378_v28 = vmul.f32 %v1559_v21, %v377_v27 }
 0x14d   : > { %v382_v31 = vsel %vm381_vm4, %v1559_v21, %v378_v28 }
 0x14e   : > { %v383_v32 = vmul.f32 %v382_v31, %v371_v29 }
 0x150   : > { %v385_v33 = vadd.f32 %v384_v30, %v383_v32 }
 0x152   : > { %1420 = vmatmul.msk.f32.vlgmr.msra.gmra.mxu0 %vm352_vm0, %v385_v33 }
 0x1cf   : > { %v411_v35 = vpop.f32.mrf.mxu0 }
 0x1d0   : > { %v1993_v36 = vadd.f32 %v411_v35, %v390_v34 }
 0x1d2   : > { %484 = vrot.lane.b32.xlu0 %v1993_v36, %s1770_s30  ;;  %456 = vrot.lane.b32.xlu2 %v1993_v36, %s1771_s29 }
 0x1d3   : > { %418 = vrot.lane.b32.xlu1 %v1993_v36, %s1772_s10 }
 0x1da   : > { %549 = vrot.lane.b32.xlu0 %v1993_v36, %s1773_s11  ;;  %482 = vrot.lane.b32.xlu2 %v1993_v36, %s1774_s15 }
 0x1e2   : > { %547 = vrot.lane.b32.xlu0 %v1993_v36, %s1775_s12  ;;  %614 = vrot.lane.b32.xlu2 %v1993_v36, %s1776_s23 }
 0x22c   : > { %v457_v37 = vpop.permute.xlu2 %456 }
 0x22d   : > { %477 = vmatpush.msra.mxu3 %v457_v37 }
 0x234   : > { %v483_v38 = vpop.permute.xlu2 %482 }
 0x23c   : > { %v615_v39 = vpop.permute.xlu2 %614 }
 0x23d   : > { %1430 = vmatpush.xpose.msk.msrb.mxu0 %vm420_vm5, %v615_v39  ;;  %v697_v39 = vld [vmem:[%s2300_s3 + $0x18] sm:$0xff] }
 0x244   : > { %v485_v40 = vpop.permute.xlu0 %484 }
 0x245   : > { %v419_v41 = vpop.permute.xlu1 %418  ;;  %1424 = vmatpush.xpose.msk.msrb.mxu3 %vm420_vm5, %v485_v40  ;;  %v696_v40 = vld [vmem:[%s2300_s3 + $0x10] sm:$0xff] }
 0x246   : > { %1421 = vmatpush.xpose.msk.msra.mxu1 %vm420_vm5, %v419_v41  ;;  %v695_v41 = vld [vmem:[%s2300_s3 + $0x8] sm:$0xff] }
 0x249   : > { %1422 = vmatmul.msk.f32.vlgmr.msra.gmra.mxu1 %vm420_vm5, %v1993_v36 }
 0x24c   : > { %v550_v42 = vpop.permute.xlu0 %549 }
 0x24d   : > { %1427 = vmatpush.xpose.msk.msrb.mxu1 %vm420_vm5, %v550_v42  ;;  %v694_v42 = vld [vmem:[%s2300_s3] sm:$0xff] }
 0x251   : > { %713 = vmatpush.msra.mxu1 %v697_v39  ;;  %v1438_v39 = vld [vmem:[%s2299_s2 + $0x30] sm:$0xff] }
 0x253   : > { %714 = vmatpush.msra.mxu1 %v696_v40  ;;  %v1437_v40 = vld [vmem:[%s2299_s2 + $0x28] sm:$0xff] }
 0x254   : > { %v548_v43 = vpop.permute.xlu0 %547 }
 0x255   : > { %1428 = vmatmul.msk.f32.vlgmr.msrb.gmra.mxu1 %vm420_vm5, %v548_v43 }
 0x256   : > { %715 = vmatpush.msra.mxu1 %v695_v41  ;;  %v1436_v41 = vld [vmem:[%s2299_s2 + $0x20] sm:$0xff] }
 0x258   : > { %716 = vmatpush.msra.mxu1 %v694_v42 }
 0x2c6   : > { %v442_v48 = vpop.f32.mrf.mxu1 }
 0x2c7   : > { %v443_v49 = vadd.f32 %v442_v48, %v2018_v47 }
 0x2c9   : > { %v445_v50 = vsel %vm420_vm5, %v443_v49, -inf }
 0x2ca   : > { %446 = vmax.xlane.f32.xlu1 %v445_v50  ;;  %v722_v50 = vperm.slane %v1987_v23, 4 }
 0x2d2   : > { %v572_v51 = vpop.f32.mrf.mxu1 }
 0x2d3   : > { %v573_v52 = vadd.f32 %v572_v51, %v2018_v47 }
 0x2d5   : > { %v575_v53 = vsel %vm420_vm5, %v573_v52, -inf }
 0x2d6   : > { %576 = vmax.xlane.f32.xlu0 %v575_v53 }
 0x2ea   : > { %586 = vrot.lane.b32.xlu0 %v1993_v36, %s2313_s27  ;;  %s1473_s27 = sshll.u32 %s1849_s8, 3  ;;  %s1297_s8 = scalar_lea.sflag [#allocation4], %s1946_s26 }
 0x33d   : > { %v447_v54 = vpop.xlane.xlu1 %446 }
 0x33e   : > { %v448_v55 = vsub.f32 %v443_v49, %v447_v54 }
 0x340   : > { %v449_v56 = vmul.f32 1.442695, %v448_v55 }
 0x342   : > { %1560 = vpow2.f32 %v449_v56 }
 0x348   : > { %v1561_v57 = vpop.eup %1560 }
 0x349   : > { %v451_v58 = vsel %vm420_vm5, %v1561_v57, 0.0  ;;  %v577_v60 = vpop.xlane.xlu0 %576 }
 0x34a   : > { %452 = vadd.xlane.f32.xlu2 %v451_v58  ;;  %v578_v6 = vsub.f32 %v573_v52, %v577_v60  ;;  %v753_v60 = vld [vmem:[%s2301_s4 + $0x18] sm:$0xff] }
 0x34c   : > { %v579_v7 = vmul.f32 1.442695, %v578_v6  ;;  %v782_v6 = vld [vmem:[%s2302_s5 + $0x18] sm:$0xff] }
 0x35c   : > { %v587_v1 = vpop.permute.xlu0 %586 }
 0x362   : > { %612 = vrot.lane.b32.xlu2 %v1993_v36, %s1779_s9 }
 0x3bd   : > { %v453_v59 = vpop.xlane.xlu2 %452 }
 0x3be   : > { %1562 = vrcp.f32 %v453_v59 }
 0x3bf   : > { %1564 = vpow2.f32 %v579_v7 }
 0x3c4   : > { %v1563_v61 = vpop.eup %1562 }
 0x3c5   : > { %v613_v62 = vpop.permute.xlu2 %612  ;;  %v455_v63 = vmul.f32 %v1563_v61, %v1561_v57  ;;  %v1565_v12 = vpop.eup %1564  ;;  %v751_v61 = vld [vmem:[%s2301_s4 + $0x8] sm:$0xff] }
 0x3c6   : > { %1431 = vmatmul.msk.f32.vlgmr.msrb.gmra.mxu0 %vm420_vm5, %v613_v62  ;;  %v581_v13 = vsel %vm420_vm5, %v1565_v12, 0.0  ;;  %v750_v62 = vld [vmem:[%s2301_s4] sm:$0xff] }
 0x3c7   : > { %1423 = vmatmul.msk.f32.vlgmr.msra.gmra.mxu3 %vm420_vm5, %v455_v63  ;;  %v786_v63 = vld [vmem:[%s2302_s5 + $0x38] sm:$0xff] }
 0x3c8   : > { %607 = vmatpush.msra.mxu3 %v587_v1  ;;  %v785_v1 = vld [vmem:[%s2302_s5 + $0x30] sm:$0xff]  ;;  %799 = vmatpush.msra.mxu0 %v786_v63 }
 0x3ca   : > { %800 = vmatpush.msra.mxu0 %v785_v1 }
 0x3cf   : > { %1425 = vmatmul.msk.f32.vlgmr.msrb.gmra.mxu3 %vm420_vm5, %v483_v38 }
 0x3d0   : > { %770 = vmatpush.msrb.mxu3 %v753_v60 }
 0x443   : > { %v637_v2 = vpop.f32.mrf.mxu0 }
 0x444   : > { %v638_v3 = vadd.f32 %v637_v2, %v2018_v47  ;;  %v784_v2 = vld [vmem:[%s2302_s5 + $0x28] sm:$0xff] }
 0x445   : > { %801 = vmatpush.msra.mxu0 %v784_v2 }
 0x446   : > { %v640_v4 = vsel %vm420_vm5, %v638_v3, -inf }
 0x447   : > { %641 = vmax.xlane.f32.xlu2 %v640_v4 }
 0x44a   : > { %v2034_v5 = vpop.f32.mrf.mxu3 }
 0x452   : > { %v507_v9 = vpop.f32.mrf.mxu3 }
 0x453   : > { %v508_v10 = vadd.f32 %v507_v9, %v2018_v47 }
 0x455   : > { %v510_v11 = vsel %vm420_vm5, %v508_v10, -inf }
 0x456   : > { %511 = vmax.xlane.f32.xlu1 %v510_v11 }
 0x45e   : > { %582 = vadd.xlane.f32.xlu1 %v581_v13  ;;  %v734_v13 = vperm.slane %v1987_v23, 2 }
 0x45f   : > { %651 = vrot.lane.b32.xlu2 %v1993_v36, %s2315_s16 }
 0x4ba   : > { %v642_v14 = vpop.xlane.xlu2 %641 }
 0x4bb   : > { %v643_v15 = vsub.f32 %v638_v3, %v642_v14  ;;  %v783_v3 = vld [vmem:[%s2302_s5 + $0x20] sm:$0xff] }
 0x4bc   : > { %802 = vmatpush.msra.mxu0 %v783_v3 }
 0x4bd   : > { %v644_v16 = vmul.f32 1.442695, %v643_v15 }
 0x4be   : > { %803 = vmatpush.msra.mxu0 %v782_v6 }
 0x4bf   : > { %1566 = vpow2.f32 %v644_v16 }
 0x4c2   : > { %v652_v34 = vpop.permute.xlu2 %651 }
 0x4c5   : > { %v1567_v17 = vpop.eup %1566 }
 0x4c6   : > { %v646_v18 = vsel %vm420_vm5, %v1567_v17, 0.0 }
 0x4c7   : > { %647 = vadd.xlane.f32.xlu1 %v646_v18 }
 0x4c9   : > { %v512_v19 = vpop.xlane.xlu1 %511 }
 0x4ca   : > { %v513_v20 = vsub.f32 %v508_v10, %v512_v19 }
 0x4cc   : > { %v514_v21 = vmul.f32 1.442695, %v513_v20 }
 0x4ce   : > { %1568 = vpow2.f32 %v514_v21  ;;  %v781_v21 = vld [vmem:[%s2302_s5 + $0x10] sm:$0xff] }
 0x4cf   : > { %804 = vmatpush.msra.mxu0 %v781_v21 }
 0x4d1   : > { %v583_v22 = vpop.xlane.xlu1 %582 }
 0x4d2   : > { %1570 = vrcp.f32 %v583_v22  ;;  %v780_v22 = vld [vmem:[%s2302_s5 + $0x8] sm:$0xff] }
 0x4d3   : > { %805 = vmatpush.msra.mxu0 %v780_v22 }
 0x4d4   : > { %v1569_v24 = vpop.eup %1568 }
 0x4d5   : > { %v516_v25 = vsel %vm420_vm5, %v1569_v24, 0.0 }
 0x4d6   : > { %517 = vadd.xlane.f32.xlu1 %v516_v25  ;;  %v754_v25 = vperm.slane %v1987_v23, 6 }
 0x4d8   : > { %v1571_v26 = vpop.eup %1570 }
 0x4d9   : > { %v585_v27 = vmul.f32 %v1571_v26, %v1565_v12 }
 0x4db   : > { %1429 = vmatmul.msk.f32.vlgmr.msra.gmra.mxu3 %vm420_vm5, %v585_v27 }
 0x4ef   : > { %521 = vrot.lane.b32.xlu1 %v1993_v36, %s1781_s20 }
 0x53a   : > { %v648_v28 = vpop.xlane.xlu1 %647 }
 0x549   : > { %v518_v29 = vpop.xlane.xlu1 %517 }
 0x54a   : > { %1572 = vrcp.f32 %v518_v29  ;;  %v812_v29 = vperm.slane %v1987_v23, 5 }
 0x54b   : > { %1574 = vrcp.f32 %v648_v28 }
 0x550   : > { %v1573_v30 = vpop.eup %1572 }
 0x551   : > { %v520_v33 = vmul.f32 %v1573_v30, %v1569_v24  ;;  %v1575_v35 = vpop.eup %1574  ;;  %v779_v24 = vld [vmem:[%s2302_s5] sm:$0xff] }
 0x552   : > { %v650_v37 = vmul.f32 %v1575_v35, %v1567_v17  ;;  %v748_v17 = vperm.slane %v1987_v23, 3  ;;  %806 = vmatpush.msra.mxu0 %v779_v24  ;;  %v1439_v23 = vld [vmem:[%s2299_s2 + $0x38] sm:$0xff] }
 0x55e   : > { %v609_v31 = vpop.f32.mrf.mxu3 }
 0x55f   : > { %682 = vrot.lane.b32.xlu0 %v609_v31, %s2311_s14 }
 0x561   : > { %v522_v32 = vpop.permute.xlu1 %521 }
 0x562   : > { %542 = vmatpush.msra.mxu2 %v522_v32 }
 0x563   : > { %1426 = vmatmul.msk.f32.vlgmr.msra.gmra.mxu2 %vm420_vm5, %v520_v33 }
 0x564   : > { %672 = vmatpush.msrb.mxu2 %v652_v34 }
 0x566   : > { %863 = vmatpush.msra.mxu2 %v1439_v23 }
 0x568   : > { %864 = vmatpush.msra.mxu2 %v1438_v39 }
 0x56a   : > { %865 = vmatpush.msra.mxu2 %v1437_v40 }
 0x56b   : > { %1432 = vmatmul.msk.f32.vlgmr.msrb.gmra.mxu2 %vm420_vm5, %v650_v37 }
 0x56c   : > { %866 = vmatpush.msra.mxu2 %v1436_v41 }
 0x5d1   : > { %v683_v45 = vpop.permute.xlu0 %682 }
 0x5e6   : > { %v544_v36 = vpop.f32.mrf.mxu2 }
 0x5e7   : > { %678 = vrot.lane.b32.xlu1 %v544_v36, %s2312_s17 }
 0x5ee   : > { %v674_v38 = vpop.f32.mrf.mxu2 }
 0x5ef   : > { %686 = vrot.lane.b32.xlu1 %v674_v38, %s2314_s13 }
 0x659   : > { %v679_v43 = vpop.permute.xlu1 %678 }
 0x65a   : > { %v689_v44 = vsel %vm420_vm5, %v2034_v5, %v679_v43 }
 0x65b   : > { %v691_v46 = vsel %vm690_vm7, %v689_v44, %v683_v45 }
 0x661   : > { %v687_v48 = vpop.permute.xlu1 %686 }
 0x662   : > { %v693_v49 = vsel %vm692_vm8, %v691_v46, %v687_v48  ;;  %v2134_v48 = vld [vmem:[#allocation7 + $0x8] sm:$0xff] }
 0x663   : > { %1433 = vmatmul.msk.f32.vlgmr.msra.gmra.mxu1 %vm352_vm0, %v693_v49 }
 0x6e0   : > { %v718_v51 = vpop.f32.mrf.mxu1 }
 0x6e1   : > { %v721_v52 = vadd.f32 %v718_v51, %v1966_v0  ;;  %v752_v0 = vld [vmem:[%s2301_s4 + $0x10] sm:$0xff]  ;;  %v826_v51 = vperm.slane %v2134_v48, 0 }
 0x6e2   : > { %771 = vmatpush.msrb.mxu3 %v752_v0 }
 0x6e3   : > { %v723_v53 = vadd.f32 %v722_v50, %v721_v52 }
 0x6e4   : > { %772 = vmatpush.msrb.mxu3 %v751_v61 }
 0x6e5   : > { %v724_v54 = vsel %vm352_vm0, %v723_v53, 0.0 }
 0x6e6   : > { %725 = vadd.xlane.f32.xlu2 %v724_v54  ;;  %773 = vmatpush.msrb.mxu3 %v750_v62 }
 0x759   : > { %v726_v55 = vpop.xlane.xlu2 %725 }
 0x75a   : > { %v727_v56 = vmul.f32 %v726_v55, %v1970_v8  ;;  %v840_v55 = vperm.slane %v2134_v48, 1 }
 0x75c   : > { %v728_v57 = vsub.f32 %v723_v53, %v727_v56 }
 0x75e   : > { %v729_v58 = vmul.f32 %v728_v57, %v728_v57  ;;  %v735_v16 = vmul.f32 %v734_v13, %v728_v57 }
 0x760   : > { %v730_v59 = vsel %vm352_vm0, %v729_v58, 0.0 }
 0x761   : > { %731 = vadd.xlane.f32.xlu0 %v730_v59  ;;  %v847_v59 = vperm.slane %v2134_v48, 7 }
 0x7d4   : > { %v732_v4 = vpop.xlane.xlu0 %731 }
 0x7d5   : > { %v733_v5 = vmul.f32 0.032258064, %v732_v4 }
 0x7d7   : > { %v736_v7 = vadd.f32 1e-06, %v733_v5 }
 0x7d9   : > { %1576 = vrsqrt.f32 %v736_v7  ;;  %vm743_vm10 = vweird.f32 %v736_v7 }
 0x7df   : > { %v1577_v9 = vpop.eup %1576 }
 0x7e0   : > { %v738_v10 = vmul.f32 %v1577_v9, %v736_v7  ;;  %vm744_vm9 = vweird.f32 %v1577_v9 }
 0x7e1   : > { %vm745_vm11 = vmor %vm743_vm10, %vm744_vm9 }
 0x7e2   : > { %v739_v11 = vmul.f32 %v1577_v9, %v738_v10 }
 0x7e4   : > { %v740_v12 = vmul.f32 0.5, %v739_v11 }
 0x7e6   : > { %v741_v14 = vsub.f32 1.5, %v740_v12 }
 0x7e8   : > { %v742_v15 = vmul.f32 %v1577_v9, %v741_v14 }
 0x7ea   : > { %v746_v18 = vsel %vm745_vm11, %v1577_v9, %v742_v15 }
 0x7eb   : > { %v747_v19 = vmul.f32 %v746_v18, %v735_v16 }
 0x7ed   : > { %v749_v20 = vadd.f32 %v748_v17, %v747_v19 }
 0x7ef   : > { %1434 = vmatmul.msk.f32.vlgmr.msrb.gmra.mxu3 %vm352_vm0, %v749_v20 }
 0x872   : > { %v775_v26 = vpop.f32.mrf.mxu3 }
 0x873   : > { %v776_v27 = vadd.f32 %v775_v26, %v754_v25 }
 0x875   : > { %v778_v28 = vmax.f32 %v776_v27, 0.0 }
 0x877   : > { %1435 = vmatmul.msk.f32.vlgmr.msra.gmra.mxu0 %vm787_vm12, %v778_v28 }
 0x8f4   : > { %v808_v30 = vpop.f32.mrf.mxu0 }
 0x8f5   : > { %v811_v31 = vadd.f32 %v808_v30, %v723_v53 }
 0x8f7   : > { %v2115_v32 = vadd.f32 %v812_v29, %v811_v31 }
 0x8f9   : > { %v816_v33 = vsel %vm352_vm0, %v2115_v32, 0.0 }
 0x8fa   : > { %817 = vadd.xlane.f32.xlu1 %v816_v33 }
 0x96d   : > { %v818_v34 = vpop.xlane.xlu1 %817 }
 0x96e   : > { %v819_v35 = vmul.f32 %v818_v34, %v1970_v8 }
 0x970   : > { %v820_v37 = vsub.f32 %v2115_v32, %v819_v35 }
 0x972   : > { %v821_v36 = vmul.f32 %v820_v37, %v820_v37  ;;  %v827_v54 = vmul.f32 %v826_v51, %v820_v37 }
 0x974   : > { %v822_v38 = vsel %vm352_vm0, %v821_v36, 0.0 }
 0x975   : > { %823 = vadd.xlane.f32.xlu2 %v822_v38 }
 0x9e8   : > { %v824_v42 = vpop.xlane.xlu2 %823 }
 0x9e9   : > { %v825_v43 = vmul.f32 0.032258064, %v824_v42 }
 0x9eb   : > { %v828_v44 = vadd.f32 1e-06, %v825_v43 }
 0x9ed   : > { %1578 = vrsqrt.f32 %v828_v44  ;;  %vm835_vm14 = vweird.f32 %v828_v44 }
 0x9f3   : > { %v1579_v45 = vpop.eup %1578 }
 0x9f4   : > { %v830_v46 = vmul.f32 %v1579_v45, %v828_v44  ;;  %vm836_vm13 = vweird.f32 %v1579_v45 }
 0x9f5   : > { %vm837_vm15 = vmor %vm835_vm14, %vm836_vm13 }
 0x9f6   : > { %v831_v49 = vmul.f32 %v1579_v45, %v830_v46 }
 0x9f8   : > { %v832_v50 = vmul.f32 0.5, %v831_v49 }
 0x9fa   : > { %v833_v52 = vsub.f32 1.5, %v832_v50 }
 0x9fc   : > { %v834_v53 = vmul.f32 %v1579_v45, %v833_v52 }
 0x9fe   : > { %v838_v56 = vsel %vm837_vm15, %v1579_v45, %v834_v53 }
 0x9ff   : > { %v839_v57 = vmul.f32 %v838_v56, %v827_v54 }
 0xa01   : > { %v841_v58 = vadd.f32 %v840_v55, %v839_v57 }
 0xa03   : > { %1440 = vmatmul.msk.f32.vlgmr.msra.gmra.mxu2 %vm352_vm0, %v841_v58 }
 0xa86   : > { %v868_v60 = vpop.f32.mrf.mxu2 }
 0xa87   : > { %v2140_v0 = vadd.f32 %v868_v60, %v847_v59  ;;  %v1456_v60 = vld [vmem:[%s2300_s3 + $0x38] sm:$0xff] }
 0xa89   : > { %909 = vrot.lane.b32.xlu2 %v2140_v0, %s1771_s29  ;;  %872 = vrot.lane.b32.xlu0 %v2140_v0, %s1772_s10  ;;  %s2330_s29 = smov 48   ;;  %s2331_s10 = smov 8  }
 0xa91   : > { %935 = vrot.lane.b32.xlu0 %v2140_v0, %s1774_s15  ;;  %s2333_s15 = smov 16  }
 0xa99   : > { %1002 = vrot.lane.b32.xlu0 %v2140_v0, %s1773_s11  ;;  %s2332_s11 = smov 24  }
 0xaa1   : > { %1000 = vrot.lane.b32.xlu0 %v2140_v0, %s1775_s12 }
 0xae3   : > { %v910_v61 = vpop.permute.xlu2 %909 }
 0xae4   : > { %930 = vmatpush.msra.mxu3 %v910_v61  ;;  %v1454_v61 = vld [vmem:[%s2300_s3 + $0x28] sm:$0xff] }
 0xafb   : > { %v873_v62 = vpop.permute.xlu0 %872 }
 0xafc   : > { %1441 = vmatpush.xpose.msk.msrb.mxu1 %vm420_vm5, %v873_v62  ;;  %v1453_v62 = vld [vmem:[%s2300_s3 + $0x20] sm:$0xff] }
 0xaff   : > { %1442 = vmatmul.msk.f32.vlgmr.msrb.gmra.mxu1 %vm420_vm5, %v2140_v0 }
 0xb03   : > { %v936_v63 = vpop.permute.xlu0 %935 }
 0xb0b   : > { %v1003_v1 = vpop.permute.xlu0 %1002 }
 0xb0c   : > { %1447 = vmatpush.xpose.msk.msrb.mxu3 %vm420_vm5, %v1003_v1 }
 0xb13   : > { %v1001_v17 = vpop.permute.xlu0 %1000 }
 0xb7c   : > { %v895_v2 = vpop.f32.mrf.mxu1 }
 0xb7d   : > { %v896_v3 = vadd.f32 %v895_v2, %v2018_v47 }
 0xb7f   : > { %v898_v4 = vsel %vm420_vm5, %v896_v3, -inf }
 0xb80   : > { %899 = vmax.xlane.f32.xlu1 %v898_v4 }
 0xb99   : > { %937 = vrot.lane.b32.xlu1 %v2140_v0, %s1770_s30  ;;  %s2329_s30 = smov 40  }
 0xba1   : > { %1067 = vrot.lane.b32.xlu1 %v2140_v0, %s1776_s23 }
 0xbf3   : > { %v900_v5 = vpop.xlane.xlu1 %899 }
 0xbf4   : > { %v901_v6 = vsub.f32 %v896_v3, %v900_v5 }
 0xbf6   : > { %v902_v7 = vmul.f32 1.442695, %v901_v6  ;;  %v1174_v6 = vperm.slane %v2134_v48, 4 }
 0xbf8   : > { %1580 = vpow2.f32 %v902_v7 }
 0xbfe   : > { %v1581_v9 = vpop.eup %1580 }
 0xbff   : > { %v904_v10 = vsel %vm420_vm5, %v1581_v9, 0.0 }
 0xc00   : > { %905 = vadd.xlane.f32.xlu2 %v904_v10 }
 0xc0b   : > { %v938_v11 = vpop.permute.xlu1 %937 }
 0xc0c   : > { %1444 = vmatpush.xpose.msk.msrb.mxu2 %vm420_vm5, %v938_v11 }
 0xc0f   : > { %1445 = vmatmul.msk.f32.vlgmr.msrb.gmra.mxu2 %vm420_vm5, %v936_v63 }
 0xc13   : > { %v1068_v12 = vpop.permute.xlu1 %1067 }
 0xc14   : > { %1450 = vmatpush.xpose.msk.msra.mxu2 %vm420_vm5, %v1068_v12 }
 0xc18   : > { %1065 = vrot.lane.b32.xlu2 %v2140_v0, %s1779_s9 }
 0xc73   : > { %v906_v13 = vpop.xlane.xlu2 %905 }
 0xc74   : > { %1582 = vrcp.f32 %v906_v13 }
 0xc7a   : > { %v1583_v14 = vpop.eup %1582 }
 0xc7b   : > { %v908_v15 = vmul.f32 %v1583_v14, %v1581_v9  ;;  %v1066_v16 = vpop.permute.xlu2 %1065 }
 0xc7c   : > { %1451 = vmatmul.msk.f32.vlgmr.msra.gmra.mxu2 %vm420_vm5, %v1066_v16 }
 0xc7d   : > { %1443 = vmatmul.msk.f32.vlgmr.msra.gmra.mxu3 %vm420_vm5, %v908_v15 }
 0xc7e   : > { %1165 = vmatpush.msra.mxu3 %v1456_v60 }
 0xc85   : > { %1448 = vmatmul.msk.f32.vlgmr.msrb.gmra.mxu3 %vm420_vm5, %v1001_v17  ;;  %v1461_v17 = vld [vmem:[%s2301_s4 + $0x38] sm:$0xff] }
 0xc92   : > { %v960_v18 = vpop.f32.mrf.mxu2 }
 0xc93   : > { %v961_v19 = vadd.f32 %v960_v18, %v2018_v47  ;;  %v1459_v18 = vld [vmem:[%s2301_s4 + $0x28] sm:$0xff] }
 0xc95   : > { %v963_v20 = vsel %vm420_vm5, %v961_v19, -inf }
 0xc96   : > { %964 = vmax.xlane.f32.xlu1 %v963_v20  ;;  %v1470_v20 = vld [vmem:[%s2302_s5 + $0x78] sm:$0xff] }
 0xc97   : > { %1252 = vmatpush.msrb.mxu2 %v1470_v20 }
 0xcff   : > { %v1090_v21 = vpop.f32.mrf.mxu2 }
 0xd00   : > { %v1091_v22 = vadd.f32 %v1090_v21, %v2018_v47  ;;  %v2174_v24 = vpop.f32.mrf.mxu3  ;;  %v1469_v21 = vld [vmem:[%s2302_s5 + $0x70] sm:$0xff] }
 0xd01   : > { %1253 = vmatpush.msrb.mxu2 %v1469_v21 }
 0xd02   : > { %v1093_v25 = vsel %vm420_vm5, %v1091_v22, -inf }
 0xd03   : > { %1094 = vmax.xlane.f32.xlu2 %v1093_v25 }
 0xd08   : > { %v1025_v26 = vpop.f32.mrf.mxu3 }
 0xd09   : > { %v1026_v27 = vadd.f32 %v1025_v26, %v2018_v47  ;;  %v965_v28 = vpop.xlane.xlu1 %964 }
 0xd0a   : > { %v966_v29 = vsub.f32 %v961_v19, %v965_v28  ;;  %v1458_v19 = vld [vmem:[%s2301_s4 + $0x20] sm:$0xff] }
 0xd0b   : > { %v1028_v30 = vsel %vm420_vm5, %v1026_v27, -inf }
 0xd0c   : > { %v967_v31 = vmul.f32 1.442695, %v966_v29  ;;  %1029 = vmax.xlane.f32.xlu0 %v1028_v30 }
 0xd0e   : > { %1584 = vpow2.f32 %v967_v31 }
 0xd14   : > { %v1585_v33 = vpop.eup %1584 }
 0xd15   : > { %v969_v34 = vsel %vm420_vm5, %v1585_v33, 0.0 }
 0xd16   : > { %970 = vadd.xlane.f32.xlu1 %v969_v34  ;;  %v1186_v34 = vperm.slane %v2134_v48, 2 }
 0xd2f   : > { %974 = vrot.lane.b32.xlu1 %v2140_v0, %s1781_s20 }
 0xd76   : > { %v1095_v35 = vpop.xlane.xlu2 %1094 }
 0xd77   : > { %v1096_v37 = vsub.f32 %v1091_v22, %v1095_v35  ;;  %v1468_v22 = vld [vmem:[%s2302_s5 + $0x68] sm:$0xff] }
 0xd78   : > { %1254 = vmatpush.msrb.mxu2 %v1468_v22 }
 0xd79   : > { %v1097_v36 = vmul.f32 1.442695, %v1096_v37 }
 0xd7b   : > { %1586 = vpow2.f32 %v1097_v36 }
 0xd7f   : > { %v1030_v38 = vpop.xlane.xlu0 %1029 }
 0xd80   : > { %v1031_v47 = vsub.f32 %v1026_v27, %v1030_v38  ;;  %v1466_v27 = vld [vmem:[%s2302_s5 + $0x58] sm:$0xff]  ;;  %v1200_v38 = vperm.slane %v2134_v48, 3 }
 0xd81   : > { %v1587_v23 = vpop.eup %1586 }
 0xd82   : > { %v1032_v39 = vmul.f32 1.442695, %v1031_v47  ;;  %v1099_v40 = vsel %vm420_vm5, %v1587_v23, 0.0 }
 0xd83   : > { %1100 = vadd.xlane.f32.xlu2 %v1099_v40  ;;  %v1465_v40 = vld [vmem:[%s2302_s5 + $0x50] sm:$0xff] }
 0xd84   : > { %1588 = vpow2.f32 %v1032_v39 }
 0xd89   : > { %v971_v43 = vpop.xlane.xlu1 %970 }
 0xd8a   : > { %v1589_v41 = vpop.eup %1588  ;;  %1590 = vrcp.f32 %v971_v43  ;;  %v1207_v43 = vperm.slane %v2134_v48, 6 }
 0xd8b   : > { %v1034_v42 = vsel %vm420_vm5, %v1589_v41, 0.0 }
 0xd8c   : > { %1035 = vadd.xlane.f32.xlu0 %v1034_v42  ;;  %v1463_v42 = vld [vmem:[%s2302_s5 + $0x40] sm:$0xff] }
 0xd90   : > { %v1591_v44 = vpop.eup %1590 }
 0xd91   : > { %v973_v45 = vmul.f32 %v1591_v44, %v1585_v33 }
 0xd9b   : > { %1104 = vrot.lane.b32.xlu2 %v2140_v0, %s2329_s30 }
 0xda0   : > { %1039 = vrot.lane.b32.xlu0 %v2140_v0, %s2330_s29  ;;  %v1455_v0 = vld [vmem:[%s2300_s3 + $0x30] sm:$0xff] }
 0xda1   : > { %v975_v46 = vpop.permute.xlu1 %974  ;;  %1166 = vmatpush.msra.mxu3 %v1455_v0 }
 0xda2   : > { %995 = vmatpush.msra.mxu1 %v975_v46 }
 0xda3   : > { %1446 = vmatmul.msk.f32.vlgmr.msra.gmra.mxu1 %vm420_vm5, %v973_v45  ;;  %1167 = vmatpush.msra.mxu3 %v1454_v61 }
 0xda5   : > { %1168 = vmatpush.msra.mxu3 %v1453_v62  ;;  %v1268_v62 = vld [vmem:[#allocation7 + $0x10] sm:$0xff] }
 0xdf6   : > { %v1101_v49 = vpop.xlane.xlu2 %1100 }
 0xdf7   : > { %1592 = vrcp.f32 %v1101_v49  ;;  %v1265_v49 = vperm.slane %v2134_v48, 5 }
 0xdfd   : > { %v1593_v50 = vpop.eup %1592 }
 0xdfe   : > { %v1103_v51 = vmul.f32 %v1593_v50, %v1587_v23  ;;  %v1105_v52 = vpop.permute.xlu2 %1104 }
 0xdff   : > { %1125 = vmatpush.msrb.mxu1 %v1105_v52  ;;  %v1036_v53 = vpop.xlane.xlu0 %1035 }
 0xe00   : > { %1452 = vmatmul.msk.f32.vlgmr.msrb.gmra.mxu1 %vm420_vm5, %v1103_v51  ;;  %1594 = vrcp.f32 %v1036_v53 }
 0xe06   : > { %v1595_v54 = vpop.eup %1594 }
 0xe07   : > { %v1038_v55 = vmul.f32 %v1595_v54, %v1589_v41  ;;  %v1464_v41 = vld [vmem:[%s2302_s5 + $0x48] sm:$0xff] }
 0xe12   : > { %v1040_v56 = vpop.permute.xlu0 %1039 }
 0xe13   : > { %1060 = vmatpush.msrb.mxu0 %v1040_v56 }
 0xe14   : > { %1449 = vmatmul.msk.f32.vlgmr.msrb.gmra.mxu0 %vm420_vm5, %v1038_v55 }
 0xe15   : > { %1223 = vmatpush.msra.mxu0 %v1461_v17 }
 0xe20   : > { %v997_v57 = vpop.f32.mrf.mxu1 }
 0xe21   : > { %1131 = vrot.lane.b32.xlu0 %v997_v57, %s2331_s10  ;;  %s1307_s10 = scalar_lea.hbm %s2304_s7, %s1473_s27 }
 0xe22   : > { %s1311_s23 = sshll.u32 %s1307_s10, 4  ;;  %s1312_s23 = int_to_ptr.hbm [resolvable:$true] %s1311_s23 }
 0xe23   : > { %s1704_s9 = sshra.s32 %s1312_s23, 4  ;;  %s1705_s9 = int_to_ptr.hbm [resolvable:$true] %s1704_s9 }
 0xe24   : > { %s1706_s20 = scalar_lea.hbm %s1705_s9, 8  ;;  %p1711_p7 = scmp.lt.s32.totalorder %s1705_s9, %s2304_s7 }
 0xe25   : > { %p1707_p1 = scmp.ne.s32.totalorder %s1705_s9, %s1706_s20  ;;  %p1712_p9 = scmp.lt.s32.totalorder %s1710_s6, %s1706_s20 }
 0xe27   : > { %p1708_p3 = pnand %p1707_p1, %p1889_p0  ;;  %p1713_p8 = por %p1712_p9, %p1711_p7 }
 0xe29   : > { %p1709_p13 = pneg %p1708_p3 }
 0xe2b   : > { %p1714_p10 = pnand %p1713_p8, %p1709_p13 }
 0xe7d   : > { %v1127_v58 = vpop.f32.mrf.mxu1 }
 0xe7e   : > { %1139 = vrot.lane.b32.xlu2 %v1127_v58, %s2332_s11  ;;  %s2334_s11 = sshll.u32 %s1946_s26, 3 }
 0xe91   : > { %v1062_v59 = vpop.f32.mrf.mxu0 }
 0xe92   : > { %1135 = vrot.lane.b32.xlu1 %v1062_v59, %s2333_s15  ;;  %s346_s15 = scalar_lea.vmem [#allocation8], %s2334_s11 }
 0xe93   : > { %v1132_v63 = vpop.permute.xlu0 %1131  ;;  %s1309_s12 = sshll.u32 %s346_s15, 4  ;;  %s1310_s12 = int_to_ptr.vmem [resolvable:$true] %s1309_s12 }
 0xe94   : > { %v1142_v1 = vsel %vm420_vm5, %v2174_v24, %v1132_v63  ;;  %v1467_v24 = vld [vmem:[%s2302_s5 + $0x60] sm:$0xff] }
 0xe95   : > { %1255 = vmatpush.msrb.mxu2 %v1467_v24 }
 0xe97   : > { %1256 = vmatpush.msrb.mxu2 %v1466_v27 }
 0xe99   : > { %1257 = vmatpush.msrb.mxu2 %v1465_v40 }
 0xe9b   : > { %1258 = vmatpush.msrb.mxu2 %v1464_v41 }
 0xe9d   : > { %1259 = vmatpush.msrb.mxu2 %v1463_v42 }
 0xed8   : > { %v1140_v3 = vpop.permute.xlu2 %1139 }
 0xf04   : > { %v1136_v2 = vpop.permute.xlu1 %1135 }
 0xf05   : > { %v1143_v4 = vsel %vm690_vm7, %v1142_v1, %v1136_v2  ;;  %v1279_v2 = vperm.slane %v1268_v62, 0 }
 0xf06   : > { %v1144_v5 = vsel %vm692_vm8, %v1143_v4, %v1140_v3  ;;  %v1293_v4 = vperm.slane %v1268_v62, 1 }
 0xf07   : > { %1457 = vmatmul.msk.f32.vlgmr.msra.gmra.mxu3 %vm352_vm0, %v1144_v5 }
 0xf8a   : > { %v1170_v7 = vpop.f32.mrf.mxu3 }
 0xf8b   : > { %v1173_v9 = vadd.f32 %v1170_v7, %v2115_v32  ;;  %v1460_v32 = vld [vmem:[%s2301_s4 + $0x30] sm:$0xff] }
 0xf8c   : > { %1224 = vmatpush.msra.mxu0 %v1460_v32 }
 0xf8d   : > { %v1175_v10 = vadd.f32 %v1174_v6, %v1173_v9 }
 0xf8e   : > { %1225 = vmatpush.msra.mxu0 %v1459_v18 }
 0xf8f   : > { %v1176_v11 = vsel %vm352_vm0, %v1175_v10, 0.0 }
 0xf90   : > { %1177 = vadd.xlane.f32.xlu0 %v1176_v11  ;;  %1226 = vmatpush.msra.mxu0 %v1458_v19 }
0x1003   : > { %v1178_v12 = vpop.xlane.xlu0 %1177 }
0x1004   : > { %v1179_v13 = vmul.f32 %v1178_v12, %v1970_v8 }
0x1006   : > { %v1180_v14 = vsub.f32 %v1175_v10, %v1179_v13 }
0x1008   : > { %v1181_v15 = vmul.f32 %v1180_v14, %v1180_v14  ;;  %v1187_v36 = vmul.f32 %v1186_v34, %v1180_v14 }
0x100a   : > { %v1182_v16 = vsel %vm352_vm0, %v1181_v15, 0.0 }
0x100b   : > { %1183 = vadd.xlane.f32.xlu1 %v1182_v16 }
0x107e   : > { %v1184_v25 = vpop.xlane.xlu1 %1183 }
0x107f   : > { %v1185_v26 = vmul.f32 0.032258064, %v1184_v25 }
0x1081   : > { %v1188_v28 = vadd.f32 1e-06, %v1185_v26 }
0x1083   : > { %1596 = vrsqrt.f32 %v1188_v28  ;;  %vm1195_vm2 = vweird.f32 %v1188_v28 }
0x1089   : > { %v1597_v29 = vpop.eup %1596 }
0x108a   : > { %v1190_v30 = vmul.f32 %v1597_v29, %v1188_v28  ;;  %vm1196_vm1 = vweird.f32 %v1597_v29 }
0x108b   : > { %vm1197_vm3 = vmor %vm1195_vm2, %vm1196_vm1 }
0x108c   : > { %v1191_v31 = vmul.f32 %v1597_v29, %v1190_v30 }
0x108e   : > { %v1192_v33 = vmul.f32 0.5, %v1191_v31 }
0x1090   : > { %v1193_v35 = vsub.f32 1.5, %v1192_v33 }
0x1092   : > { %v1194_v37 = vmul.f32 %v1597_v29, %v1193_v35 }
0x1094   : > { %v1198_v47 = vsel %vm1197_vm3, %v1597_v29, %v1194_v37 }
0x1095   : > { %v1199_v23 = vmul.f32 %v1198_v47, %v1187_v36 }
0x1097   : > { %v1201_v39 = vadd.f32 %v1200_v38, %v1199_v23 }
0x1099   : > { %1462 = vmatmul.msk.f32.vlgmr.msra.gmra.mxu0 %vm352_vm0, %v1201_v39 }
0x1116   : > { %v1228_v44 = vpop.f32.mrf.mxu0 }
0x1117   : > { %v1229_v45 = vadd.f32 %v1228_v44, %v1207_v43 }
0x1119   : > { %v1231_v46 = vmax.f32 %v1229_v45, 0.0 }
0x111b   : > { %1471 = vmatmul.msk.f32.vlgmr.msrb.gmra.mxu2 %vm787_vm12, %v1231_v46 }
0x119e   : > { %v1261_v50 = vpop.f32.mrf.mxu2 }
0x119f   : > { %v1264_v51 = vadd.f32 %v1261_v50, %v1175_v10 }
0x11a1   : > { %v1266_v52 = vadd.f32 %v1265_v49, %v1264_v51 }
0x11a3   : > { %v1269_v53 = vsel %vm352_vm0, %v1266_v52, 0.0 }
0x11a4   : > { %1270 = vadd.xlane.f32.xlu2 %v1269_v53 }
0x1217   : > { %v1271_v54 = vpop.xlane.xlu2 %1270 }
0x1218   : > { %v1272_v55 = vmul.f32 %v1271_v54, %v1970_v8 }
0x121a   : > { %v1273_v56 = vsub.f32 %v1266_v52, %v1272_v55 }
0x121c   : > { %v1274_v57 = vmul.f32 %v1273_v56, %v1273_v56  ;;  %v1280_v5 = vmul.f32 %v1279_v2, %v1273_v56 }
0x121e   : > { %v1275_v58 = vsel %vm352_vm0, %v1274_v57, 0.0 }
0x121f   : > { %1276 = vadd.xlane.f32.xlu0 %v1275_v58 }
0x1292   : > { %v1277_v59 = vpop.xlane.xlu0 %1276 }
0x1293   : > { %v1278_v60 = vmul.f32 0.032258064, %v1277_v59 }
0x1295   : > { %v1281_v0 = vadd.f32 1e-06, %v1278_v60 }
0x1297   : > { %1598 = vrsqrt.f32 %v1281_v0  ;;  %vm1288_vm5 = vweird.f32 %v1281_v0 }
0x129d   : > { %v1599_v48 = vpop.eup %1598 }
0x129e   : > { %v1283_v61 = vmul.f32 %v1599_v48, %v1281_v0  ;;  %vm1289_vm4 = vweird.f32 %v1599_v48 }
0x129f   : > { %vm1290_vm6 = vmor %vm1288_vm5, %vm1289_vm4 }
0x12a0   : > { %v1284_v63 = vmul.f32 %v1599_v48, %v1283_v61 }
0x12a2   : > { %v1285_v1 = vmul.f32 0.5, %v1284_v63 }
0x12a4   : > { %v1286_v3 = vsub.f32 1.5, %v1285_v1 }
0x12a6   : > { %v1287_v8 = vmul.f32 %v1599_v48, %v1286_v3 }
0x12a8   : > { %v1291_v6 = vsel %vm1290_vm6, %v1599_v48, %v1287_v8 }
0x12a9   : > { %v1292_v7 = vmul.f32 %v1291_v6, %v1280_v5 }
0x12ab   : > { %v1294_v9 = vadd.f32 %v1293_v4, %v1292_v7 }
0x12ad   : > { %1295 = vst.msk [vmem:[%s346_s15] sm:$0xff] %vm352_vm0, %v1294_v9 }
0x12ae   : > { %1717 = shalt.err (!%p1714_p10)
}
0x12af   : > { %1484 = dma.vmem_to_hbm [thread:$0]  (%p1889_p0), %s1310_s12, 128, %s1312_s23, %s1297_s8  }
0x12b0 PF: > { %s2336_s16 = sld [smem:[#allocation14_spill]]  ;;  %s1323_s13 = sand.u32 1, %s1752_s24  }
0x12b1   : > { %s1324_s28 = scalar_lea.sflag [#allocation4], %s1323_s13 }
0x12b6   : > { %p2337_p11 = scmp.ge.s32.totalorder %s2336_s16, 2 }
0x12b8   : > { %p1498_p5 = pnand %p2337_p11, %p1897_p6 }
0x12ba   : > { %p1499_p12 = pneg %p1498_p5 }
0x12bc   : > { %1747 = dma.done.wait (%p1499_p12), %s1324_s28, 128  }
0x12bd   : > { %1749 = vsyncadd (%p1499_p12), %s1324_s28, 4294967168  ;;  %s2338_s27 = sld [smem:[#allocation15_spill]]  ;;  %s2341_s24 = smov %s1756_s25 }
0x12be   : > { %s2339_s22 = sld [smem:[#allocation13_spill]] }
0x12bf   : > { %s2340_s26 = sld [smem:[#allocation16_spill]] }
0x12c3   : > { %p23_p2 = scmp.ge.s32.totalorder %s2338_s27, 4  }
0x12c4   : > { %s2342_s25 = smov %s2339_s22 }
0x12c5   :  { %25 = sbr.rel (!%p23_p2) target bundleno = 9 (0x9), region = 116 }
0x12ca   :  { %1330 = vsyncpa [#allocation3], 1 }
0x12cb   :  { %1332 = vsyncpa [#allocation3 + $0x1], 1 }
0x12cc   :  { %1333 = vsyncpa [#allocation6], 1 }
0x12cd   :  { %1335 = vsyncpa [#allocation6 + $0x1], 1 }
0x12ce   :  { %1336 = vsyncpa [#allocation4], 1 }
0x12cf   :  { %1338 = vsyncpa [#allocation4 + $0x1], 1 }

</bundles_post_ra>
